<compile_context>
chip_gen: v7x
topology: tpu7x:2x2x1
jax: 0.10.0
libtpu: 0.0.40
codegen_flags: <defaults>
</compile_context>

<pallas_src>
import functools

import jax
import jax.numpy as jnp
from jax import lax
from jax.experimental import pallas as pl
from jax.experimental.pallas import tpu as pltpu

LANES = 128  # pad all channel dims to the 128-lane vreg width (lane-dense)


# ----------------------------- Pallas kernel ------------------------------ #
def _build_fused_kernel(batch, layer_cfgs, apply_relu):
    """Build a kernel that runs every conv+ReLU layer back-to-back in VMEM.

    layer_cfgs: tuple of (K, stride, L_in, L_out) per layer (all static).

    Activation layout (input, scratch and output): (batch * L, LANES) f32,
    row = (b, time) position, channels in lanes (zero-padded to 128).
    Weight layout per layer: (K, LANES, LANES) f32, w_pad[k, ci, co] = w[co, ci, k].
    Bias layout per layer: (1, LANES) f32.
    """
    n_layers = len(layer_cfgs)

    def kernel(*refs):
        x_ref = refs[0]
        w_refs = [refs[1 + 2 * i] for i in range(n_layers)]
        b_refs = [refs[2 + 2 * i] for i in range(n_layers)]
        o_ref = refs[1 + 2 * n_layers]
        act_refs = list(refs[2 + 2 * n_layers:])  # n_layers - 1 VMEM scratches

        in_ref = x_ref
        for i, (k_taps, stride, l_in, l_out) in enumerate(layer_cfgs):
            out_ref = o_ref if i == n_layers - 1 else act_refs[i]
            w_ref = w_refs[i]
            b_ref = b_refs[i]
            for b in range(batch):  # static unroll (tiny batch)
                base = b * l_in
                acc = jnp.zeros((l_out, LANES), jnp.float32)
                for k in range(k_taps):  # static unroll over taps
                    if stride == 1:
                        rows = in_ref[pl.ds(base + k, l_out), :]
                    else:
                        rows = in_ref[pl.ds(base + k, l_out, stride=stride), :]
                    acc = acc + jnp.dot(
                        rows, w_ref[k], preferred_element_type=jnp.float32
                    )
                acc = acc + b_ref[...]
                if apply_relu:
                    acc = jnp.maximum(acc, 0.0)
                out_ref[pl.ds(b * l_out, l_out), :] = acc
            in_ref = out_ref

    return kernel


# ----------------------------- Module wrapper ------------------------------ #
class Conv1dBasePallas:
    """JAX/Pallas re-implementation of robomimic Conv1dBase (activation='relu')."""

    def __init__(
        self,
        input_channel=1,
        activation="relu",
        out_channels=(32, 64, 64),
        kernel_size=(8, 4, 2),
        stride=(4, 2, 1),
        key=None,
    ):
        assert activation in ("relu", None, "None")
        self.apply_relu = activation == "relu"
        self.input_channel = int(input_channel)
        self.out_channels = tuple(int(c) for c in out_channels)
        self.kernel_size = tuple(int(k) for k in kernel_size)
        self.stride = tuple(int(s) for s in stride)
        self.n_layers = len(self.out_channels)
        assert self.input_channel <= LANES and max(self.out_channels) <= LANES

        if key is None:
            key = jax.random.PRNGKey(0)

        # Deterministic init mirroring nn.Conv1d default (uniform(-b, b),
        # b = 1/sqrt(fan_in), fan_in = C_in * K), for both weight and bias.
        self.weights = []   # original (C_out, C_in, K) -- used by the reference
        self.biases = []    # original (C_out,)
        self._w_pad = []    # kernel layout (K, 128, 128), built once
        self._b_pad = []    # kernel layout (1, 128), built once
        c_in = self.input_channel
        for i in range(self.n_layers):
            c_out, k_sz = self.out_channels[i], self.kernel_size[i]
            key, kw, kb = jax.random.split(key, 3)
            bound = 1.0 / (c_in * k_sz) ** 0.5
            w = jax.random.uniform(
                kw, (c_out, c_in, k_sz), jnp.float32, minval=-bound, maxval=bound
            )
            b = jax.random.uniform(
                kb, (c_out,), jnp.float32, minval=-bound, maxval=bound
            )
            self.weights.append(w)
            self.biases.append(b)

            # Precompute the kernel-side layout once (perf feedback item):
            # (C_out, C_in, K) -> (K, C_in, C_out), zero-padded to 128x128 so
            # every in-kernel matmul is lane-dense and padded lanes contribute 0.
            w_t = jnp.transpose(w, (2, 1, 0))  # (K, C_in, C_out)
            w_p = jnp.zeros((k_sz, LANES, LANES), jnp.float32)
            w_p = w_p.at[:, :c_in, :c_out].set(w_t)
            b_p = jnp.zeros((1, LANES), jnp.float32).at[0, :c_out].set(b)
            self._w_pad.append(w_p)
            self._b_pad.append(b_p)
            c_in = c_out

        # Whole forward (layout glue + fused kernel + final slice) under jit.
        self._forward = jax.jit(self._forward_impl)

    def output_shape(self, input_shape):
        channels, length = input_shape
        for i in range(self.n_layers):
            channels = self.out_channels[i]
            length = (length - (self.kernel_size[i] - 1) - 1) // self.stride[i] + 1
        return [channels, length]

    def _forward_impl(self, x):
        batch, c_in, length = x.shape  # static under jit
        assert c_in == self.input_channel

        # Static per-layer geometry.
        layer_cfgs = []
        l_in = length
        for i in range(self.n_layers):
            k_sz, s = self.kernel_size[i], self.stride[i]
            l_out = (l_in - k_sz) // s + 1
            assert l_out >= 1, "input too short for this conv stack"
            layer_cfgs.append((k_sz, s, l_in, l_out))
            l_in = l_out
        l_final = l_in
        c_final = self.out_channels[-1]

        # NCW -> channel-last, lane-padded, time-flattened: (B*L, 128).
        xp = jnp.transpose(x, (0, 2, 1))                       # (B, L, C_in)
        xp = jnp.pad(xp, ((0, 0), (0, 0), (0, LANES - c_in)))  # (B, L, 128)
        xp = xp.reshape(batch * length, LANES)

        kernel = _build_fused_kernel(batch, tuple(layer_cfgs), self.apply_relu)

        params = []
        for w_p, b_p in zip(self._w_pad, self._b_pad):
            params += [w_p, b_p]
        n_inputs = 1 + 2 * self.n_layers

        out_flat = pl.pallas_call(
            kernel,
            out_shape=jax.ShapeDtypeStruct((batch * l_final, LANES), jnp.float32),
            in_specs=[pl.BlockSpec(memory_space=pltpu.MemorySpace.VMEM)] * n_inputs,
            out_specs=pl.BlockSpec(memory_space=pltpu.MemorySpace.VMEM),
            scratch_shapes=[
                pltpu.VMEM((batch * cfg[3], LANES), jnp.float32)
                for cfg in layer_cfgs[:-1]
            ],
        )(xp, *params)

        # (B*L_out, 128) -> (B, C_out, L_out); tiny slice/transpose fused by jit.
        out = out_flat.reshape(batch, l_final, LANES)[:, :, :c_final]
        return jnp.transpose(out, (0, 2, 1))

    def __call__(self, x):
        return self._forward(x)


# ----------------------------- Reference (pure JAX) ------------------------ #
def _reference_forward(model, x):
    for i in range(model.n_layers):
        x = lax.conv_general_dilated(
            x,
            model.weights[i],
            window_strides=(model.stride[i],),
            padding="VALID",
            dimension_numbers=("NCH", "OIH", "NCH"),
        )
        x = x + model.biases[i][None, :, None]
        if model.apply_relu:
            x = jnp.maximum(x, 0.0)
    return x


if __name__ == "__main__":
    key = jax.random.PRNGKey(0)
    key, kx = jax.random.split(key)

    B, C_IN, L = 2, 1, 64
    x = jax.random.normal(kx, (B, C_IN, L), dtype=jnp.float32)

    model = Conv1dBasePallas(input_channel=C_IN, activation="relu", key=key)

    out = jax.block_until_ready(model(x))

    # Shape check matching Conv1dBase.forward's assertion.
    expected = model.output_shape([C_IN, L])
    assert list(out.shape[1:]) == expected, (out.shape, expected)

    # Numerical check against a pure-JAX conv reference.
    ref = jax.block_until_ready(_reference_forward(model, x))
    assert jnp.allclose(out, ref, atol=1e-5, rtol=1e-5), float(
        jnp.max(jnp.abs(out - ref))
    )

    print("KERNEL_OK")
</pallas_src>

<mosaic_0001>
module attributes {stable_mosaic.version = 11 : i64} {
  func.func @kernel(%arg0: memref<128x128xf32, #tpu.memory_space<vmem>>, %arg1: memref<8x128x128xf32, #tpu.memory_space<vmem>>, %arg2: memref<1x128xf32, #tpu.memory_space<vmem>>, %arg3: memref<4x128x128xf32, #tpu.memory_space<vmem>>, %arg4: memref<1x128xf32, #tpu.memory_space<vmem>>, %arg5: memref<2x128x128xf32, #tpu.memory_space<vmem>>, %arg6: memref<1x128xf32, #tpu.memory_space<vmem>>, %arg7: memref<10x128xf32, #tpu.memory_space<vmem>>, %arg8: memref<30x128xf32, #tpu.memory_space<vmem>>, %arg9: memref<12x128xf32, #tpu.memory_space<vmem>>) attributes {dimension_semantics = [], scalar_prefetch = 0 : i64, scratch_operands = 2 : i64, tpu.core_type = #tpu.core_type<tc>} {
    %cst = arith.constant 0.000000e+00 : f32
    %0 = vector.broadcast %cst : f32 to vector<15x128xf32>
    %c0 = arith.constant 0 : index
    %c0_0 = arith.constant 0 : index
    %1 = tpu.strided_load %arg0[%c0, %c0_0] {strides = array<i32: 4, 1>} : memref<128x128xf32, #tpu.memory_space<vmem>>, vector<15x128xf32>
    %c0_1 = arith.constant 0 : index
    %c0_2 = arith.constant 0 : index
    %c0_3 = arith.constant 0 : index
    %2 = vector.load %arg1[%c0_1, %c0_2, %c0_3] : memref<8x128x128xf32, #tpu.memory_space<vmem>>, vector<1x128x128xf32>
    %3 = vector.shape_cast %2 : vector<1x128x128xf32> to vector<128x128xf32>
    %cst_4 = arith.constant dense<0.000000e+00> : vector<15x128xf32>
    %4 = tpu.matmul %1, %3, %cst_4 {dimension_numbers = #tpu.dot_dimension_numbers<[1], [0], [0], [1], [0, 0, 1, 1], [], []>} : vector<15x128xf32>, vector<128x128xf32>, vector<15x128xf32> -> vector<15x128xf32>
    %5 = arith.addf %0, %4 : vector<15x128xf32>
    %c1 = arith.constant 1 : index
    %c0_5 = arith.constant 0 : index
    %6 = tpu.strided_load %arg0[%c1, %c0_5] {strides = array<i32: 4, 1>} : memref<128x128xf32, #tpu.memory_space<vmem>>, vector<15x128xf32>
    %c1_6 = arith.constant 1 : index
    %c0_7 = arith.constant 0 : index
    %c0_8 = arith.constant 0 : index
    %7 = vector.load %arg1[%c1_6, %c0_7, %c0_8] : memref<8x128x128xf32, #tpu.memory_space<vmem>>, vector<1x128x128xf32>
    %8 = vector.shape_cast %7 : vector<1x128x128xf32> to vector<128x128xf32>
    %cst_9 = arith.constant dense<0.000000e+00> : vector<15x128xf32>
    %9 = tpu.matmul %6, %8, %cst_9 {dimension_numbers = #tpu.dot_dimension_numbers<[1], [0], [0], [1], [0, 0, 1, 1], [], []>} : vector<15x128xf32>, vector<128x128xf32>, vector<15x128xf32> -> vector<15x128xf32>
    %10 = arith.addf %5, %9 : vector<15x128xf32>
    %c2 = arith.constant 2 : index
    %c0_10 = arith.constant 0 : index
    %11 = tpu.strided_load %arg0[%c2, %c0_10] {strides = array<i32: 4, 1>} : memref<128x128xf32, #tpu.memory_space<vmem>>, vector<15x128xf32>
    %c2_11 = arith.constant 2 : index
    %c0_12 = arith.constant 0 : index
    %c0_13 = arith.constant 0 : index
    %12 = vector.load %arg1[%c2_11, %c0_12, %c0_13] : memref<8x128x128xf32, #tpu.memory_space<vmem>>, vector<1x128x128xf32>
    %13 = vector.shape_cast %12 : vector<1x128x128xf32> to vector<128x128xf32>
    %cst_14 = arith.constant dense<0.000000e+00> : vector<15x128xf32>
    %14 = tpu.matmul %11, %13, %cst_14 {dimension_numbers = #tpu.dot_dimension_numbers<[1], [0], [0], [1], [0, 0, 1, 1], [], []>} : vector<15x128xf32>, vector<128x128xf32>, vector<15x128xf32> -> vector<15x128xf32>
    %15 = arith.addf %10, %14 : vector<15x128xf32>
    %c3 = arith.constant 3 : index
    %c0_15 = arith.constant 0 : index
    %16 = tpu.strided_load %arg0[%c3, %c0_15] {strides = array<i32: 4, 1>} : memref<128x128xf32, #tpu.memory_space<vmem>>, vector<15x128xf32>
    %c3_16 = arith.constant 3 : index
    %c0_17 = arith.constant 0 : index
    %c0_18 = arith.constant 0 : index
    %17 = vector.load %arg1[%c3_16, %c0_17, %c0_18] : memref<8x128x128xf32, #tpu.memory_space<vmem>>, vector<1x128x128xf32>
    %18 = vector.shape_cast %17 : vector<1x128x128xf32> to vector<128x128xf32>
    %cst_19 = arith.constant dense<0.000000e+00> : vector<15x128xf32>
    %19 = tpu.matmul %16, %18, %cst_19 {dimension_numbers = #tpu.dot_dimension_numbers<[1], [0], [0], [1], [0, 0, 1, 1], [], []>} : vector<15x128xf32>, vector<128x128xf32>, vector<15x128xf32> -> vector<15x128xf32>
    %20 = arith.addf %15, %19 : vector<15x128xf32>
    %c4 = arith.constant 4 : index
    %c0_20 = arith.constant 0 : index
    %21 = tpu.strided_load %arg0[%c4, %c0_20] {strides = array<i32: 4, 1>} : memref<128x128xf32, #tpu.memory_space<vmem>>, vector<15x128xf32>
    %c4_21 = arith.constant 4 : index
    %c0_22 = arith.constant 0 : index
    %c0_23 = arith.constant 0 : index
    %22 = vector.load %arg1[%c4_21, %c0_22, %c0_23] : memref<8x128x128xf32, #tpu.memory_space<vmem>>, vector<1x128x128xf32>
    %23 = vector.shape_cast %22 : vector<1x128x128xf32> to vector<128x128xf32>
    %cst_24 = arith.constant dense<0.000000e+00> : vector<15x128xf32>
    %24 = tpu.matmul %21, %23, %cst_24 {dimension_numbers = #tpu.dot_dimension_numbers<[1], [0], [0], [1], [0, 0, 1, 1], [], []>} : vector<15x128xf32>, vector<128x128xf32>, vector<15x128xf32> -> vector<15x128xf32>
    %25 = arith.addf %20, %24 : vector<15x128xf32>
    %c5 = arith.constant 5 : index
    %c0_25 = arith.constant 0 : index
    %26 = tpu.strided_load %arg0[%c5, %c0_25] {strides = array<i32: 4, 1>} : memref<128x128xf32, #tpu.memory_space<vmem>>, vector<15x128xf32>
    %c5_26 = arith.constant 5 : index
    %c0_27 = arith.constant 0 : index
    %c0_28 = arith.constant 0 : index
    %27 = vector.load %arg1[%c5_26, %c0_27, %c0_28] : memref<8x128x128xf32, #tpu.memory_space<vmem>>, vector<1x128x128xf32>
    %28 = vector.shape_cast %27 : vector<1x128x128xf32> to vector<128x128xf32>
    %cst_29 = arith.constant dense<0.000000e+00> : vector<15x128xf32>
    %29 = tpu.matmul %26, %28, %cst_29 {dimension_numbers = #tpu.dot_dimension_numbers<[1], [0], [0], [1], [0, 0, 1, 1], [], []>} : vector<15x128xf32>, vector<128x128xf32>, vector<15x128xf32> -> vector<15x128xf32>
    %30 = arith.addf %25, %29 : vector<15x128xf32>
    %c6 = arith.constant 6 : index
    %c0_30 = arith.constant 0 : index
    %31 = tpu.strided_load %arg0[%c6, %c0_30] {strides = array<i32: 4, 1>} : memref<128x128xf32, #tpu.memory_space<vmem>>, vector<15x128xf32>
    %c6_31 = arith.constant 6 : index
    %c0_32 = arith.constant 0 : index
    %c0_33 = arith.constant 0 : index
    %32 = vector.load %arg1[%c6_31, %c0_32, %c0_33] : memref<8x128x128xf32, #tpu.memory_space<vmem>>, vector<1x128x128xf32>
    %33 = vector.shape_cast %32 : vector<1x128x128xf32> to vector<128x128xf32>
    %cst_34 = arith.constant dense<0.000000e+00> : vector<15x128xf32>
    %34 = tpu.matmul %31, %33, %cst_34 {dimension_numbers = #tpu.dot_dimension_numbers<[1], [0], [0], [1], [0, 0, 1, 1], [], []>} : vector<15x128xf32>, vector<128x128xf32>, vector<15x128xf32> -> vector<15x128xf32>
    %35 = arith.addf %30, %34 : vector<15x128xf32>
    %c7 = arith.constant 7 : index
    %c0_35 = arith.constant 0 : index
    %36 = tpu.strided_load %arg0[%c7, %c0_35] {strides = array<i32: 4, 1>} : memref<128x128xf32, #tpu.memory_space<vmem>>, vector<15x128xf32>
    %c7_36 = arith.constant 7 : index
    %c0_37 = arith.constant 0 : index
    %c0_38 = arith.constant 0 : index
    %37 = vector.load %arg1[%c7_36, %c0_37, %c0_38] : memref<8x128x128xf32, #tpu.memory_space<vmem>>, vector<1x128x128xf32>
    %38 = vector.shape_cast %37 : vector<1x128x128xf32> to vector<128x128xf32>
    %cst_39 = arith.constant dense<0.000000e+00> : vector<15x128xf32>
    %39 = tpu.matmul %36, %38, %cst_39 {dimension_numbers = #tpu.dot_dimension_numbers<[1], [0], [0], [1], [0, 0, 1, 1], [], []>} : vector<15x128xf32>, vector<128x128xf32>, vector<15x128xf32> -> vector<15x128xf32>
    %40 = arith.addf %35, %39 : vector<15x128xf32>
    %c0_40 = arith.constant 0 : index
    %c0_41 = arith.constant 0 : index
    %41 = vector.load %arg2[%c0_40, %c0_41] : memref<1x128xf32, #tpu.memory_space<vmem>>, vector<1x128xf32>
    %42 = vector.broadcast %41 : vector<1x128xf32> to vector<15x128xf32>
    %43 = arith.addf %40, %42 : vector<15x128xf32>
    %cst_42 = arith.constant 0.000000e+00 : f32
    %44 = vector.broadcast %cst_42 : f32 to vector<15x128xf32>
    %45 = arith.maximumf %43, %44 : vector<15x128xf32>
    %c0_43 = arith.constant 0 : index
    %c0_44 = arith.constant 0 : index
    %46 = vector.load %arg8[%c0_43, %c0_44] : memref<30x128xf32, #tpu.memory_space<vmem>>, vector<15x128xf32>
    tpu.vector_store %arg8[%c0_43, %c0_44], %45 {strides = array<i32>} : memref<30x128xf32, #tpu.memory_space<vmem>>, vector<15x128xf32>,
    %cst_45 = arith.constant 0.000000e+00 : f32
    %47 = vector.broadcast %cst_45 : f32 to vector<15x128xf32>
    %c64 = arith.constant 64 : index
    %c0_46 = arith.constant 0 : index
    %48 = tpu.strided_load %arg0[%c64, %c0_46] {strides = array<i32: 4, 1>} : memref<128x128xf32, #tpu.memory_space<vmem>>, vector<15x128xf32>
    %c0_47 = arith.constant 0 : index
    %c0_48 = arith.constant 0 : index
    %c0_49 = arith.constant 0 : index
    %49 = vector.load %arg1[%c0_47, %c0_48, %c0_49] : memref<8x128x128xf32, #tpu.memory_space<vmem>>, vector<1x128x128xf32>
    %50 = vector.shape_cast %49 : vector<1x128x128xf32> to vector<128x128xf32>
    %cst_50 = arith.constant dense<0.000000e+00> : vector<15x128xf32>
    %51 = tpu.matmul %48, %50, %cst_50 {dimension_numbers = #tpu.dot_dimension_numbers<[1], [0], [0], [1], [0, 0, 1, 1], [], []>} : vector<15x128xf32>, vector<128x128xf32>, vector<15x128xf32> -> vector<15x128xf32>
    %52 = arith.addf %47, %51 : vector<15x128xf32>
    %c65 = arith.constant 65 : index
    %c0_51 = arith.constant 0 : index
    %53 = tpu.strided_load %arg0[%c65, %c0_51] {strides = array<i32: 4, 1>} : memref<128x128xf32, #tpu.memory_space<vmem>>, vector<15x128xf32>
    %c1_52 = arith.constant 1 : index
    %c0_53 = arith.constant 0 : index
    %c0_54 = arith.constant 0 : index
    %54 = vector.load %arg1[%c1_52, %c0_53, %c0_54] : memref<8x128x128xf32, #tpu.memory_space<vmem>>, vector<1x128x128xf32>
    %55 = vector.shape_cast %54 : vector<1x128x128xf32> to vector<128x128xf32>
    %cst_55 = arith.constant dense<0.000000e+00> : vector<15x128xf32>
    %56 = tpu.matmul %53, %55, %cst_55 {dimension_numbers = #tpu.dot_dimension_numbers<[1], [0], [0], [1], [0, 0, 1, 1], [], []>} : vector<15x128xf32>, vector<128x128xf32>, vector<15x128xf32> -> vector<15x128xf32>
    %57 = arith.addf %52, %56 : vector<15x128xf32>
    %c66 = arith.constant 66 : index
    %c0_56 = arith.constant 0 : index
    %58 = tpu.strided_load %arg0[%c66, %c0_56] {strides = array<i32: 4, 1>} : memref<128x128xf32, #tpu.memory_space<vmem>>, vector<15x128xf32>
    %c2_57 = arith.constant 2 : index
    %c0_58 = arith.constant 0 : index
    %c0_59 = arith.constant 0 : index
    %59 = vector.load %arg1[%c2_57, %c0_58, %c0_59] : memref<8x128x128xf32, #tpu.memory_space<vmem>>, vector<1x128x128xf32>
    %60 = vector.shape_cast %59 : vector<1x128x128xf32> to vector<128x128xf32>
    %cst_60 = arith.constant dense<0.000000e+00> : vector<15x128xf32>
    %61 = tpu.matmul %58, %60, %cst_60 {dimension_numbers = #tpu.dot_dimension_numbers<[1], [0], [0], [1], [0, 0, 1, 1], [], []>} : vector<15x128xf32>, vector<128x128xf32>, vector<15x128xf32> -> vector<15x128xf32>
    %62 = arith.addf %57, %61 : vector<15x128xf32>
    %c67 = arith.constant 67 : index
    %c0_61 = arith.constant 0 : index
    %63 = tpu.strided_load %arg0[%c67, %c0_61] {strides = array<i32: 4, 1>} : memref<128x128xf32, #tpu.memory_space<vmem>>, vector<15x128xf32>
    %c3_62 = arith.constant 3 : index
    %c0_63 = arith.constant 0 : index
    %c0_64 = arith.constant 0 : index
    %64 = vector.load %arg1[%c3_62, %c0_63, %c0_64] : memref<8x128x128xf32, #tpu.memory_space<vmem>>, vector<1x128x128xf32>
    %65 = vector.shape_cast %64 : vector<1x128x128xf32> to vector<128x128xf32>
    %cst_65 = arith.constant dense<0.000000e+00> : vector<15x128xf32>
    %66 = tpu.matmul %63, %65, %cst_65 {dimension_numbers = #tpu.dot_dimension_numbers<[1], [0], [0], [1], [0, 0, 1, 1], [], []>} : vector<15x128xf32>, vector<128x128xf32>, vector<15x128xf32> -> vector<15x128xf32>
    %67 = arith.addf %62, %66 : vector<15x128xf32>
    %c68 = arith.constant 68 : index
    %c0_66 = arith.constant 0 : index
    %68 = tpu.strided_load %arg0[%c68, %c0_66] {strides = array<i32: 4, 1>} : memref<128x128xf32, #tpu.memory_space<vmem>>, vector<15x128xf32>
    %c4_67 = arith.constant 4 : index
    %c0_68 = arith.constant 0 : index
    %c0_69 = arith.constant 0 : index
    %69 = vector.load %arg1[%c4_67, %c0_68, %c0_69] : memref<8x128x128xf32, #tpu.memory_space<vmem>>, vector<1x128x128xf32>
    %70 = vector.shape_cast %69 : vector<1x128x128xf32> to vector<128x128xf32>
    %cst_70 = arith.constant dense<0.000000e+00> : vector<15x128xf32>
    %71 = tpu.matmul %68, %70, %cst_70 {dimension_numbers = #tpu.dot_dimension_numbers<[1], [0], [0], [1], [0, 0, 1, 1], [], []>} : vector<15x128xf32>, vector<128x128xf32>, vector<15x128xf32> -> vector<15x128xf32>
    %72 = arith.addf %67, %71 : vector<15x128xf32>
    %c69 = arith.constant 69 : index
    %c0_71 = arith.constant 0 : index
    %73 = tpu.strided_load %arg0[%c69, %c0_71] {strides = array<i32: 4, 1>} : memref<128x128xf32, #tpu.memory_space<vmem>>, vector<15x128xf32>
    %c5_72 = arith.constant 5 : index
    %c0_73 = arith.constant 0 : index
    %c0_74 = arith.constant 0 : index
    %74 = vector.load %arg1[%c5_72, %c0_73, %c0_74] : memref<8x128x128xf32, #tpu.memory_space<vmem>>, vector<1x128x128xf32>
    %75 = vector.shape_cast %74 : vector<1x128x128xf32> to vector<128x128xf32>
    %cst_75 = arith.constant dense<0.000000e+00> : vector<15x128xf32>
    %76 = tpu.matmul %73, %75, %cst_75 {dimension_numbers = #tpu.dot_dimension_numbers<[1], [0], [0], [1], [0, 0, 1, 1], [], []>} : vector<15x128xf32>, vector<128x128xf32>, vector<15x128xf32> -> vector<15x128xf32>
    %77 = arith.addf %72, %76 : vector<15x128xf32>
    %c70 = arith.constant 70 : index
    %c0_76 = arith.constant 0 : index
    %78 = tpu.strided_load %arg0[%c70, %c0_76] {strides = array<i32: 4, 1>} : memref<128x128xf32, #tpu.memory_space<vmem>>, vector<15x128xf32>
    %c6_77 = arith.constant 6 : index
    %c0_78 = arith.constant 0 : index
    %c0_79 = arith.constant 0 : index
    %79 = vector.load %arg1[%c6_77, %c0_78, %c0_79] : memref<8x128x128xf32, #tpu.memory_space<vmem>>, vector<1x128x128xf32>
    %80 = vector.shape_cast %79 : vector<1x128x128xf32> to vector<128x128xf32>
    %cst_80 = arith.constant dense<0.000000e+00> : vector<15x128xf32>
    %81 = tpu.matmul %78, %80, %cst_80 {dimension_numbers = #tpu.dot_dimension_numbers<[1], [0], [0], [1], [0, 0, 1, 1], [], []>} : vector<15x128xf32>, vector<128x128xf32>, vector<15x128xf32> -> vector<15x128xf32>
    %82 = arith.addf %77, %81 : vector<15x128xf32>
    %c71 = arith.constant 71 : index
    %c0_81 = arith.constant 0 : index
    %83 = tpu.strided_load %arg0[%c71, %c0_81] {strides = array<i32: 4, 1>} : memref<128x128xf32, #tpu.memory_space<vmem>>, vector<15x128xf32>
    %c7_82 = arith.constant 7 : index
    %c0_83 = arith.constant 0 : index
    %c0_84 = arith.constant 0 : index
    %84 = vector.load %arg1[%c7_82, %c0_83, %c0_84] : memref<8x128x128xf32, #tpu.memory_space<vmem>>, vector<1x128x128xf32>
    %85 = vector.shape_cast %84 : vector<1x128x128xf32> to vector<128x128xf32>
    %cst_85 = arith.constant dense<0.000000e+00> : vector<15x128xf32>
    %86 = tpu.matmul %83, %85, %cst_85 {dimension_numbers = #tpu.dot_dimension_numbers<[1], [0], [0], [1], [0, 0, 1, 1], [], []>} : vector<15x128xf32>, vector<128x128xf32>, vector<15x128xf32> -> vector<15x128xf32>
    %87 = arith.addf %82, %86 : vector<15x128xf32>
    %c0_86 = arith.constant 0 : index
    %c0_87 = arith.constant 0 : index
    %88 = vector.load %arg2[%c0_86, %c0_87] : memref<1x128xf32, #tpu.memory_space<vmem>>, vector<1x128xf32>
    %89 = vector.broadcast %88 : vector<1x128xf32> to vector<15x128xf32>
    %90 = arith.addf %87, %89 : vector<15x128xf32>
    %cst_88 = arith.constant 0.000000e+00 : f32
    %91 = vector.broadcast %cst_88 : f32 to vector<15x128xf32>
    %92 = arith.maximumf %90, %91 : vector<15x128xf32>
    %c15 = arith.constant 15 : index
    %c0_89 = arith.constant 0 : index
    %93 = vector.load %arg8[%c15, %c0_89] : memref<30x128xf32, #tpu.memory_space<vmem>>, vector<15x128xf32>
    tpu.vector_store %arg8[%c15, %c0_89], %92 {strides = array<i32>} : memref<30x128xf32, #tpu.memory_space<vmem>>, vector<15x128xf32>,
    %cst_90 = arith.constant 0.000000e+00 : f32
    %94 = vector.broadcast %cst_90 : f32 to vector<6x128xf32>
    %c0_91 = arith.constant 0 : index
    %c0_92 = arith.constant 0 : index
    %95 = tpu.strided_load %arg8[%c0_91, %c0_92] {strides = array<i32: 2, 1>} : memref<30x128xf32, #tpu.memory_space<vmem>>, vector<6x128xf32>
    %c0_93 = arith.constant 0 : index
    %c0_94 = arith.constant 0 : index
    %c0_95 = arith.constant 0 : index
    %96 = vector.load %arg3[%c0_93, %c0_94, %c0_95] : memref<4x128x128xf32, #tpu.memory_space<vmem>>, vector<1x128x128xf32>
    %97 = vector.shape_cast %96 : vector<1x128x128xf32> to vector<128x128xf32>
    %cst_96 = arith.constant dense<0.000000e+00> : vector<6x128xf32>
    %98 = tpu.matmul %95, %97, %cst_96 {dimension_numbers = #tpu.dot_dimension_numbers<[1], [0], [0], [1], [0, 0, 1, 1], [], []>} : vector<6x128xf32>, vector<128x128xf32>, vector<6x128xf32> -> vector<6x128xf32>
    %99 = arith.addf %94, %98 : vector<6x128xf32>
    %c1_97 = arith.constant 1 : index
    %c0_98 = arith.constant 0 : index
    %100 = tpu.strided_load %arg8[%c1_97, %c0_98] {strides = array<i32: 2, 1>} : memref<30x128xf32, #tpu.memory_space<vmem>>, vector<6x128xf32>
    %c1_99 = arith.constant 1 : index
    %c0_100 = arith.constant 0 : index
    %c0_101 = arith.constant 0 : index
    %101 = vector.load %arg3[%c1_99, %c0_100, %c0_101] : memref<4x128x128xf32, #tpu.memory_space<vmem>>, vector<1x128x128xf32>
    %102 = vector.shape_cast %101 : vector<1x128x128xf32> to vector<128x128xf32>
    %cst_102 = arith.constant dense<0.000000e+00> : vector<6x128xf32>
    %103 = tpu.matmul %100, %102, %cst_102 {dimension_numbers = #tpu.dot_dimension_numbers<[1], [0], [0], [1], [0, 0, 1, 1], [], []>} : vector<6x128xf32>, vector<128x128xf32>, vector<6x128xf32> -> vector<6x128xf32>
    %104 = arith.addf %99, %103 : vector<6x128xf32>
    %c2_103 = arith.constant 2 : index
    %c0_104 = arith.constant 0 : index
    %105 = tpu.strided_load %arg8[%c2_103, %c0_104] {strides = array<i32: 2, 1>} : memref<30x128xf32, #tpu.memory_space<vmem>>, vector<6x128xf32>
    %c2_105 = arith.constant 2 : index
    %c0_106 = arith.constant 0 : index
    %c0_107 = arith.constant 0 : index
    %106 = vector.load %arg3[%c2_105, %c0_106, %c0_107] : memref<4x128x128xf32, #tpu.memory_space<vmem>>, vector<1x128x128xf32>
    %107 = vector.shape_cast %106 : vector<1x128x128xf32> to vector<128x128xf32>
    %cst_108 = arith.constant dense<0.000000e+00> : vector<6x128xf32>
    %108 = tpu.matmul %105, %107, %cst_108 {dimension_numbers = #tpu.dot_dimension_numbers<[1], [0], [0], [1], [0, 0, 1, 1], [], []>} : vector<6x128xf32>, vector<128x128xf32>, vector<6x128xf32> -> vector<6x128xf32>
    %109 = arith.addf %104, %108 : vector<6x128xf32>
    %c3_109 = arith.constant 3 : index
    %c0_110 = arith.constant 0 : index
    %110 = tpu.strided_load %arg8[%c3_109, %c0_110] {strides = array<i32: 2, 1>} : memref<30x128xf32, #tpu.memory_space<vmem>>, vector<6x128xf32>
    %c3_111 = arith.constant 3 : index
    %c0_112 = arith.constant 0 : index
    %c0_113 = arith.constant 0 : index
    %111 = vector.load %arg3[%c3_111, %c0_112, %c0_113] : memref<4x128x128xf32, #tpu.memory_space<vmem>>, vector<1x128x128xf32>
    %112 = vector.shape_cast %111 : vector<1x128x128xf32> to vector<128x128xf32>
    %cst_114 = arith.constant dense<0.000000e+00> : vector<6x128xf32>
    %113 = tpu.matmul %110, %112, %cst_114 {dimension_numbers = #tpu.dot_dimension_numbers<[1], [0], [0], [1], [0, 0, 1, 1], [], []>} : vector<6x128xf32>, vector<128x128xf32>, vector<6x128xf32> -> vector<6x128xf32>
    %114 = arith.addf %109, %113 : vector<6x128xf32>
    %c0_115 = arith.constant 0 : index
    %c0_116 = arith.constant 0 : index
    %115 = vector.load %arg4[%c0_115, %c0_116] : memref<1x128xf32, #tpu.memory_space<vmem>>, vector<1x128xf32>
    %116 = vector.broadcast %115 : vector<1x128xf32> to vector<6x128xf32>
    %117 = arith.addf %114, %116 : vector<6x128xf32>
    %cst_117 = arith.constant 0.000000e+00 : f32
    %118 = vector.broadcast %cst_117 : f32 to vector<6x128xf32>
    %119 = arith.maximumf %117, %118 : vector<6x128xf32>
    %c0_118 = arith.constant 0 : index
    %c0_119 = arith.constant 0 : index
    %120 = vector.load %arg9[%c0_118, %c0_119] : memref<12x128xf32, #tpu.memory_space<vmem>>, vector<6x128xf32>
    tpu.vector_store %arg9[%c0_118, %c0_119], %119 {strides = array<i32>} : memref<12x128xf32, #tpu.memory_space<vmem>>, vector<6x128xf32>,
    %cst_120 = arith.constant 0.000000e+00 : f32
    %121 = vector.broadcast %cst_120 : f32 to vector<6x128xf32>
    %c15_121 = arith.constant 15 : index
    %c0_122 = arith.constant 0 : index
    %122 = tpu.strided_load %arg8[%c15_121, %c0_122] {strides = array<i32: 2, 1>} : memref<30x128xf32, #tpu.memory_space<vmem>>, vector<6x128xf32>
    %c0_123 = arith.constant 0 : index
    %c0_124 = arith.constant 0 : index
    %c0_125 = arith.constant 0 : index
    %123 = vector.load %arg3[%c0_123, %c0_124, %c0_125] : memref<4x128x128xf32, #tpu.memory_space<vmem>>, vector<1x128x128xf32>
    %124 = vector.shape_cast %123 : vector<1x128x128xf32> to vector<128x128xf32>
    %cst_126 = arith.constant dense<0.000000e+00> : vector<6x128xf32>
    %125 = tpu.matmul %122, %124, %cst_126 {dimension_numbers = #tpu.dot_dimension_numbers<[1], [0], [0], [1], [0, 0, 1, 1], [], []>} : vector<6x128xf32>, vector<128x128xf32>, vector<6x128xf32> -> vector<6x128xf32>
    %126 = arith.addf %121, %125 : vector<6x128xf32>
    %c16 = arith.constant 16 : index
    %c0_127 = arith.constant 0 : index
    %127 = tpu.strided_load %arg8[%c16, %c0_127] {strides = array<i32: 2, 1>} : memref<30x128xf32, #tpu.memory_space<vmem>>, vector<6x128xf32>
    %c1_128 = arith.constant 1 : index
    %c0_129 = arith.constant 0 : index
    %c0_130 = arith.constant 0 : index
    %128 = vector.load %arg3[%c1_128, %c0_129, %c0_130] : memref<4x128x128xf32, #tpu.memory_space<vmem>>, vector<1x128x128xf32>
    %129 = vector.shape_cast %128 : vector<1x128x128xf32> to vector<128x128xf32>
    %cst_131 = arith.constant dense<0.000000e+00> : vector<6x128xf32>
    %130 = tpu.matmul %127, %129, %cst_131 {dimension_numbers = #tpu.dot_dimension_numbers<[1], [0], [0], [1], [0, 0, 1, 1], [], []>} : vector<6x128xf32>, vector<128x128xf32>, vector<6x128xf32> -> vector<6x128xf32>
    %131 = arith.addf %126, %130 : vector<6x128xf32>
    %c17 = arith.constant 17 : index
    %c0_132 = arith.constant 0 : index
    %132 = tpu.strided_load %arg8[%c17, %c0_132] {strides = array<i32: 2, 1>} : memref<30x128xf32, #tpu.memory_space<vmem>>, vector<6x128xf32>
    %c2_133 = arith.constant 2 : index
    %c0_134 = arith.constant 0 : index
    %c0_135 = arith.constant 0 : index
    %133 = vector.load %arg3[%c2_133, %c0_134, %c0_135] : memref<4x128x128xf32, #tpu.memory_space<vmem>>, vector<1x128x128xf32>
    %134 = vector.shape_cast %133 : vector<1x128x128xf32> to vector<128x128xf32>
    %cst_136 = arith.constant dense<0.000000e+00> : vector<6x128xf32>
    %135 = tpu.matmul %132, %134, %cst_136 {dimension_numbers = #tpu.dot_dimension_numbers<[1], [0], [0], [1], [0, 0, 1, 1], [], []>} : vector<6x128xf32>, vector<128x128xf32>, vector<6x128xf32> -> vector<6x128xf32>
    %136 = arith.addf %131, %135 : vector<6x128xf32>
    %c18 = arith.constant 18 : index
    %c0_137 = arith.constant 0 : index
    %137 = tpu.strided_load %arg8[%c18, %c0_137] {strides = array<i32: 2, 1>} : memref<30x128xf32, #tpu.memory_space<vmem>>, vector<6x128xf32>
    %c3_138 = arith.constant 3 : index
    %c0_139 = arith.constant 0 : index
    %c0_140 = arith.constant 0 : index
    %138 = vector.load %arg3[%c3_138, %c0_139, %c0_140] : memref<4x128x128xf32, #tpu.memory_space<vmem>>, vector<1x128x128xf32>
    %139 = vector.shape_cast %138 : vector<1x128x128xf32> to vector<128x128xf32>
    %cst_141 = arith.constant dense<0.000000e+00> : vector<6x128xf32>
    %140 = tpu.matmul %137, %139, %cst_141 {dimension_numbers = #tpu.dot_dimension_numbers<[1], [0], [0], [1], [0, 0, 1, 1], [], []>} : vector<6x128xf32>, vector<128x128xf32>, vector<6x128xf32> -> vector<6x128xf32>
    %141 = arith.addf %136, %140 : vector<6x128xf32>
    %c0_142 = arith.constant 0 : index
    %c0_143 = arith.constant 0 : index
    %142 = vector.load %arg4[%c0_142, %c0_143] : memref<1x128xf32, #tpu.memory_space<vmem>>, vector<1x128xf32>
    %143 = vector.broadcast %142 : vector<1x128xf32> to vector<6x128xf32>
    %144 = arith.addf %141, %143 : vector<6x128xf32>
    %cst_144 = arith.constant 0.000000e+00 : f32
    %145 = vector.broadcast %cst_144 : f32 to vector<6x128xf32>
    %146 = arith.maximumf %144, %145 : vector<6x128xf32>
    %c6_145 = arith.constant 6 : index
    %c0_146 = arith.constant 0 : index
    %147 = vector.load %arg9[%c6_145, %c0_146] : memref<12x128xf32, #tpu.memory_space<vmem>>, vector<6x128xf32>
    tpu.vector_store %arg9[%c6_145, %c0_146], %146 {strides = array<i32>} : memref<12x128xf32, #tpu.memory_space<vmem>>, vector<6x128xf32>,
    %cst_147 = arith.constant 0.000000e+00 : f32
    %148 = vector.broadcast %cst_147 : f32 to vector<5x128xf32>
    %c0_148 = arith.constant 0 : index
    %c0_149 = arith.constant 0 : index
    %149 = vector.load %arg9[%c0_148, %c0_149] : memref<12x128xf32, #tpu.memory_space<vmem>>, vector<5x128xf32>
    %c0_150 = arith.constant 0 : index
    %c0_151 = arith.constant 0 : index
    %c0_152 = arith.constant 0 : index
    %150 = vector.load %arg5[%c0_150, %c0_151, %c0_152] : memref<2x128x128xf32, #tpu.memory_space<vmem>>, vector<1x128x128xf32>
    %151 = vector.shape_cast %150 : vector<1x128x128xf32> to vector<128x128xf32>
    %cst_153 = arith.constant dense<0.000000e+00> : vector<5x128xf32>
    %152 = tpu.matmul %149, %151, %cst_153 {dimension_numbers = #tpu.dot_dimension_numbers<[1], [0], [0], [1], [0, 0, 1, 1], [], []>} : vector<5x128xf32>, vector<128x128xf32>, vector<5x128xf32> -> vector<5x128xf32>
    %153 = arith.addf %148, %152 : vector<5x128xf32>
    %c1_154 = arith.constant 1 : index
    %c0_155 = arith.constant 0 : index
    %154 = vector.load %arg9[%c1_154, %c0_155] : memref<12x128xf32, #tpu.memory_space<vmem>>, vector<5x128xf32>
    %c1_156 = arith.constant 1 : index
    %c0_157 = arith.constant 0 : index
    %c0_158 = arith.constant 0 : index
    %155 = vector.load %arg5[%c1_156, %c0_157, %c0_158] : memref<2x128x128xf32, #tpu.memory_space<vmem>>, vector<1x128x128xf32>
    %156 = vector.shape_cast %155 : vector<1x128x128xf32> to vector<128x128xf32>
    %cst_159 = arith.constant dense<0.000000e+00> : vector<5x128xf32>
    %157 = tpu.matmul %154, %156, %cst_159 {dimension_numbers = #tpu.dot_dimension_numbers<[1], [0], [0], [1], [0, 0, 1, 1], [], []>} : vector<5x128xf32>, vector<128x128xf32>, vector<5x128xf32> -> vector<5x128xf32>
    %158 = arith.addf %153, %157 : vector<5x128xf32>
    %c0_160 = arith.constant 0 : index
    %c0_161 = arith.constant 0 : index
    %159 = vector.load %arg6[%c0_160, %c0_161] : memref<1x128xf32, #tpu.memory_space<vmem>>, vector<1x128xf32>
    %160 = vector.broadcast %159 : vector<1x128xf32> to vector<5x128xf32>
    %161 = arith.addf %158, %160 : vector<5x128xf32>
    %cst_162 = arith.constant 0.000000e+00 : f32
    %162 = vector.broadcast %cst_162 : f32 to vector<5x128xf32>
    %163 = arith.maximumf %161, %162 : vector<5x128xf32>
    %c0_163 = arith.constant 0 : index
    %c0_164 = arith.constant 0 : index
    %164 = vector.load %arg7[%c0_163, %c0_164] : memref<10x128xf32, #tpu.memory_space<vmem>>, vector<5x128xf32>
    tpu.vector_store %arg7[%c0_163, %c0_164], %163 {strides = array<i32>} : memref<10x128xf32, #tpu.memory_space<vmem>>, vector<5x128xf32>,
    %cst_165 = arith.constant 0.000000e+00 : f32
    %165 = vector.broadcast %cst_165 : f32 to vector<5x128xf32>
    %c6_166 = arith.constant 6 : index
    %c0_167 = arith.constant 0 : index
    %166 = vector.load %arg9[%c6_166, %c0_167] : memref<12x128xf32, #tpu.memory_space<vmem>>, vector<5x128xf32>
    %c0_168 = arith.constant 0 : index
    %c0_169 = arith.constant 0 : index
    %c0_170 = arith.constant 0 : index
    %167 = vector.load %arg5[%c0_168, %c0_169, %c0_170] : memref<2x128x128xf32, #tpu.memory_space<vmem>>, vector<1x128x128xf32>
    %168 = vector.shape_cast %167 : vector<1x128x128xf32> to vector<128x128xf32>
    %cst_171 = arith.constant dense<0.000000e+00> : vector<5x128xf32>
    %169 = tpu.matmul %166, %168, %cst_171 {dimension_numbers = #tpu.dot_dimension_numbers<[1], [0], [0], [1], [0, 0, 1, 1], [], []>} : vector<5x128xf32>, vector<128x128xf32>, vector<5x128xf32> -> vector<5x128xf32>
    %170 = arith.addf %165, %169 : vector<5x128xf32>
    %c7_172 = arith.constant 7 : index
    %c0_173 = arith.constant 0 : index
    %171 = vector.load %arg9[%c7_172, %c0_173] : memref<12x128xf32, #tpu.memory_space<vmem>>, vector<5x128xf32>
    %c1_174 = arith.constant 1 : index
    %c0_175 = arith.constant 0 : index
    %c0_176 = arith.constant 0 : index
    %172 = vector.load %arg5[%c1_174, %c0_175, %c0_176] : memref<2x128x128xf32, #tpu.memory_space<vmem>>, vector<1x128x128xf32>
    %173 = vector.shape_cast %172 : vector<1x128x128xf32> to vector<128x128xf32>
    %cst_177 = arith.constant dense<0.000000e+00> : vector<5x128xf32>
    %174 = tpu.matmul %171, %173, %cst_177 {dimension_numbers = #tpu.dot_dimension_numbers<[1], [0], [0], [1], [0, 0, 1, 1], [], []>} : vector<5x128xf32>, vector<128x128xf32>, vector<5x128xf32> -> vector<5x128xf32>
    %175 = arith.addf %170, %174 : vector<5x128xf32>
    %c0_178 = arith.constant 0 : index
    %c0_179 = arith.constant 0 : index
    %176 = vector.load %arg6[%c0_178, %c0_179] : memref<1x128xf32, #tpu.memory_space<vmem>>, vector<1x128xf32>
    %177 = vector.broadcast %176 : vector<1x128xf32> to vector<5x128xf32>
    %178 = arith.addf %175, %177 : vector<5x128xf32>
    %cst_180 = arith.constant 0.000000e+00 : f32
    %179 = vector.broadcast %cst_180 : f32 to vector<5x128xf32>
    %180 = arith.maximumf %178, %179 : vector<5x128xf32>
    %c5_181 = arith.constant 5 : index
    %c0_182 = arith.constant 0 : index
    %181 = vector.load %arg7[%c5_181, %c0_182] : memref<10x128xf32, #tpu.memory_space<vmem>>, vector<5x128xf32>
    tpu.vector_store %arg7[%c5_181, %c0_182], %180 {strides = array<i32>} : memref<10x128xf32, #tpu.memory_space<vmem>>, vector<5x128xf32>,
    return
  }
}

</mosaic_0001>

<bundles_post_ra>
// kernel: _forward_impl.1
= control target key start
LH: loop header
LB: loop body
LE: loop exit
PB: predicated region body
PF: predicated region fallthrough
CT: control target
= control target key end

     0   :  { %12 = vsyncpa [#allocation5], 0  ;;  %s5741_s0 = inlined_call_operand.vmem [shape: f32[128,128], index: 0, kind: input, shape index: {}]   ;;  %s5742_s1 = inlined_call_operand.hbm [shape: f32[8,128,128], index: 1, kind: input, shape index: {}]   ;;  %s5743_s2 = inlined_call_operand.vmem [shape: f32[1,128], index: 2, kind: input, shape index: {}]   ;;  %s5744_s3 = inlined_call_operand.hbm [shape: f32[4,128,128], index: 3, kind: input, shape index: {}]   ;;  %s5745_s4 = inlined_call_operand.vmem [shape: f32[1,128], index: 4, kind: input, shape index: {}]   ;;  %s5746_s5 = inlined_call_operand.vmem [shape: f32[2,128,128], index: 5, kind: input, shape index: {}]   ;;  %s5747_s6 = inlined_call_operand.vmem [shape: f32[1,128], index: 6, kind: input, shape index: {}]   ;;  %s5748_s7 = inlined_call_operand.vmem [shape: f32[10,128], index: 7, kind: output, shape index: {}]  }
   0x1   :  { %13 = vsyncpa [#allocation7], 0  ;;  %s5159_s24 = smov [#allocation4]   ;;  %s5111_s28 = scalar_lea.hbm %s5742_s1, 16384 }
   0x2   :  { %s21_s25 = sshll.u32 %s5159_s24, 4  ;;  %p5112_p0 = scmp.ne.s32.totalorder %s5742_s1, %s5111_s28  ;;  %s22_s25 = int_to_ptr.vmem [resolvable:$true] %s21_s25 }
   0x3   :  { %p5115_p1 = scmp.lt.u32.totalorder %s5111_s28, %s5742_s1 }
   0x5   :  { %p5117_p2 = pnand %p5115_p1, %p5112_p0 }
   0x7   :  { %5120 = shalt.err (!%p5117_p2)
}
   0x8   :  { %s5121_s10 = scalar_lea.vmem %s22_s25, 16384  ;;  %p5126_p4 = scmp.lt.s32.totalorder %s22_s25, %s22_s25 }
   0x9   :  { %p5122_p3 = scmp.ne.s32.totalorder %s22_s25, %s5121_s10  ;;  %p5127_p5 = scmp.lt.s32.totalorder %s5121_s10, %s5121_s10 }
   0xb   :  { %p5128_p6 = por %p5127_p5, %p5126_p4 }
   0xd   :  { %p5129_p7 = pnand %p5128_p6, %p5122_p3 }
   0xf   :  { %5132 = shalt.err (!%p5129_p7)
}
  0x10   :  { %s5160_s11 = smov 128   ;;  %s5161_s12 = smov 8  }
  0x11   :  { %27 = dma.hbm_to_vmem [thread:$0]  %s5742_s1, 16384, %s22_s25, [#allocation5], %s5160_s11, %s5160_s11, %s5161_s12  }
  0x12   :  { %s5162_s15 = smov [#allocation6]   ;;  %s5133_s19 = scalar_lea.hbm %s5744_s3, 8192 }
  0x13   :  { %s35_s16 = sshll.u32 %s5162_s15, 4  ;;  %p5134_p8 = scmp.ne.s32.totalorder %s5744_s3, %s5133_s19  ;;  %s36_s16 = int_to_ptr.vmem [resolvable:$true] %s35_s16 }
  0x14   :  { %p5137_p9 = scmp.lt.u32.totalorder %s5133_s19, %s5744_s3 }
  0x16   :  { %p5139_p10 = pnand %p5137_p9, %p5134_p8 }
  0x18   :  { %5142 = shalt.err (!%p5139_p10)
}
  0x19   :  { %s5143_s24 = scalar_lea.vmem %s36_s16, 8192  ;;  %p5148_p12 = scmp.lt.s32.totalorder %s36_s16, %s36_s16 }
  0x1a   :  { %p5144_p11 = scmp.ne.s32.totalorder %s36_s16, %s5143_s24  ;;  %p5149_p13 = scmp.lt.s32.totalorder %s5143_s24, %s5143_s24 }
  0x1c   :  { %p5150_p0 = por %p5149_p13, %p5148_p12 }
  0x1e   :  { %p5151_p1 = pnand %p5150_p0, %p5144_p11 }
  0x20   :  { %5154 = shalt.err (!%p5151_p1)
}
  0x21   :  { %41 = dma.hbm_to_vmem [thread:$0]  %s5744_s3, 8192, %s36_s16, [#allocation7], %s5160_s11, %s5160_s11, %s5161_s12  }
  0x22   :  { %5155 = dma.done.wait [#allocation5], 16384  }
  0x23   :  { %5156 = vsyncadd [#allocation5], 4294950912 }
  0x24   :  { %5157 = dma.done.wait [#allocation7], 8192  }
  0x25   :  { %5158 = vsyncadd [#allocation7], 4294959104  ;;  %v78_v0 = vld [vmem:[#allocation4 + $0x80] sm:$0xff]  ;;  %v79_v1 = vld [vmem:[#allocation4 + $0x88] sm:$0xff]  ;;  %vm5164_vm0 = vmmov 0  }
  0x26   :  { %v80_v2 = vld [vmem:[#allocation4 + $0x90] sm:$0xff]  ;;  %v4276_v3 = vpack.c.bf16 %v79_v1, %v78_v0  ;;  %v81_v4 = vld [vmem:[#allocation4 + $0x98] sm:$0xff]  ;;  %v82_v6 = vld [vmem:[#allocation4 + $0xa0] sm:$0xff] }
  0x27   :  { %v4280_v5 = vpack.c.bf16 %v81_v4, %v80_v2  ;;  %v83_v7 = vld [vmem:[#allocation4 + $0xa8] sm:$0xff]  ;;  %v84_v10 = vld [vmem:[#allocation4 + $0xb0] sm:$0xff]  ;;  %v85_v11 = vld [vmem:[#allocation4 + $0xb8] sm:$0xff] }
  0x28   :  { %4277 = vmatprep.subr.bf16.mxu0 %v4276_v3  ;;  %4533 = vmatprep.subr.bf16.mxu1 %v4276_v3  ;;  %v4284_v8 = vpack.c.bf16 %v83_v7, %v82_v6  ;;  %v2736_v9 = vld [vmem:[%s5741_s0 + $0x1] ss:$4 sm:$0xff]  ;;  %v4288_v13 = vpack.c.bf16 %v85_v11, %v84_v10  ;;  %v54_v36 = vld [vmem:[%s5741_s0] ss:$4 sm:$0xff]  ;;  %v2738_v0 = vld [vmem:[%s5741_s0 + $0x2] ss:$4 sm:$0xff] }
  0x29   :  { %4279 = vmatpush3.bf16.msra.mxu0 %v4276_v3  ;;  %4535 = vmatpush3.bf16.msra.mxu1 %v4276_v3  ;;  %v2753_v12 = vld [vmem:[%s5741_s0 + $0x41] ss:$4 sm:$0xff]  ;;  %v2751_v37 = vld [vmem:[%s5741_s0 + $0x40] ss:$4 sm:$0xff]  ;;  %v2755_v1 = vld [vmem:[%s5741_s0 + $0x42] ss:$4 sm:$0xff] }
  0x2a   :  { %4281 = vmatprep.subr.bf16.mxu0 %v4280_v5  ;;  %4537 = vmatprep.subr.bf16.mxu1 %v4280_v5  ;;  %v86_v14 = vld [vmem:[#allocation4 + $0xc0] sm:$0xff]  ;;  %v87_v15 = vld [vmem:[#allocation4 + $0xc8] sm:$0xff]  ;;  %v88_v17 = vld [vmem:[#allocation4 + $0xd0] sm:$0xff] }
  0x2b   :  { %3328 = vmatprep.mubr.f32.mxu0 %v2736_v9  ;;  %3608 = vmatprep.mubr.f32.mxu1 %v2753_v12  ;;  %v4292_v16 = vpack.c.bf16 %v87_v15, %v86_v14  ;;  %v89_v18 = vld [vmem:[#allocation4 + $0xd8] sm:$0xff]  ;;  %v90_v20 = vld [vmem:[#allocation4 + $0xe0] sm:$0xff]  ;;  %v91_v21 = vld [vmem:[#allocation4 + $0xe8] sm:$0xff] }
  0x2c   :  { %v4296_v19 = vpack.c.bf16 %v89_v18, %v88_v17  ;;  %v4300_v22 = vpack.c.bf16 %v91_v21, %v90_v20  ;;  %v92_v23 = vld [vmem:[#allocation4 + $0xf0] sm:$0xff]  ;;  %v93_v24 = vld [vmem:[#allocation4 + $0xf8] sm:$0xff]  ;;  %v57_v26 = vld [vmem:[#allocation4] sm:$0xff] }
  0x2d   :  { %4283 = vmatpush3.bf16.msra.mxu0 %v4280_v5  ;;  %4539 = vmatpush3.bf16.msra.mxu1 %v4280_v5  ;;  %v4304_v25 = vpack.c.bf16 %v93_v24, %v92_v23  ;;  %v58_v27 = vld [vmem:[#allocation4 + $0x8] sm:$0xff]  ;;  %v59_v29 = vld [vmem:[#allocation4 + $0x10] sm:$0xff]  ;;  %v60_v30 = vld [vmem:[#allocation4 + $0x18] sm:$0xff] }
  0x2e   :  { %4285 = vmatprep.subr.bf16.mxu0 %v4284_v8  ;;  %4541 = vmatprep.subr.bf16.mxu1 %v4284_v8  ;;  %v4308_v28 = vpack.c.bf16 %v58_v27, %v57_v26  ;;  %v2737_v31 = vld [vmem:[%s5741_s0 + $0x21] ss:$4 sm:$0x7f]  ;;  %v4312_v33 = vpack.c.bf16 %v60_v30, %v59_v29  ;;  %v2735_v59 = vld [vmem:[%s5741_s0 + $0x20] ss:$4 sm:$0x7f] }
  0x2f   :  { %v2754_v32 = vld [vmem:[%s5741_s0 + $0x61] ss:$4 sm:$0x7f]  ;;  %v2752_v60 = vld [vmem:[%s5741_s0 + $0x60] ss:$4 sm:$0x7f] }
  0x30   :  { %v61_v34 = vld [vmem:[#allocation4 + $0x20] sm:$0xff]  ;;  %v62_v35 = vld [vmem:[#allocation4 + $0x28] sm:$0xff]  ;;  %v63_v39 = vld [vmem:[#allocation4 + $0x30] sm:$0xff] }
  0x31   :  { %4287 = vmatpush3.bf16.msra.mxu0 %v4284_v8  ;;  %4543 = vmatpush3.bf16.msra.mxu1 %v4284_v8  ;;  %v4316_v38 = vpack.c.bf16 %v62_v35, %v61_v34  ;;  %v64_v40 = vld [vmem:[#allocation4 + $0x38] sm:$0xff]  ;;  %v65_v42 = vld [vmem:[#allocation4 + $0x40] sm:$0xff]  ;;  %v66_v43 = vld [vmem:[#allocation4 + $0x48] sm:$0xff] }
  0x32   :  { %4289 = vmatprep.subr.bf16.mxu0 %v4288_v13  ;;  %4545 = vmatprep.subr.bf16.mxu1 %v4288_v13  ;;  %v4320_v41 = vpack.c.bf16 %v64_v40, %v63_v39  ;;  %v4324_v44 = vpack.c.bf16 %v66_v43, %v65_v42  ;;  %v67_v45 = vld [vmem:[#allocation4 + $0x50] sm:$0xff]  ;;  %v68_v46 = vld [vmem:[#allocation4 + $0x58] sm:$0xff]  ;;  %v69_v48 = vld [vmem:[#allocation4 + $0x60] sm:$0xff] }
  0x33   :  { %v4328_v47 = vpack.c.bf16 %v68_v46, %v67_v45  ;;  %v70_v49 = vld [vmem:[#allocation4 + $0x68] sm:$0xff]  ;;  %v71_v51 = vld [vmem:[#allocation4 + $0x70] sm:$0xff]  ;;  %v72_v52 = vld [vmem:[#allocation4 + $0x78] sm:$0xff] }
  0x34   :  { %v4332_v50 = vpack.c.bf16 %v70_v49, %v69_v48  ;;  %v4336_v53 = vpack.c.bf16 %v72_v52, %v71_v51  ;;  %v249_v54 = vld [vmem:[#allocation4 + $0x100] sm:$0xff]  ;;  %v250_v55 = vld [vmem:[#allocation4 + $0x108] sm:$0xff]  ;;  %v251_v57 = vld [vmem:[#allocation4 + $0x110] sm:$0xff] }
  0x35   :  { %4291 = vmatpush3.bf16.msra.mxu0 %v4288_v13  ;;  %4547 = vmatpush3.bf16.msra.mxu1 %v4288_v13  ;;  %v4340_v56 = vpack.c.bf16 %v250_v55, %v249_v54  ;;  %v252_v58 = vld [vmem:[#allocation4 + $0x118] sm:$0xff]  ;;  %v253_v62 = vld [vmem:[#allocation4 + $0x120] sm:$0xff]  ;;  %v254_v63 = vld [vmem:[#allocation4 + $0x128] sm:$0xff] }
  0x36   :  { %4293 = vmatprep.subr.bf16.mxu0 %v4292_v16  ;;  %4549 = vmatprep.subr.bf16.mxu1 %v4292_v16  ;;  %v4344_v61 = vpack.c.bf16 %v252_v58, %v251_v57  ;;  %v4348_v2 = vpack.c.bf16 %v254_v63, %v253_v62  ;;  %v255_v3 = vld [vmem:[#allocation4 + $0x130] sm:$0xff]  ;;  %v256_v4 = vld [vmem:[#allocation4 + $0x138] sm:$0xff]  ;;  %v257_v6 = vld [vmem:[#allocation4 + $0x140] sm:$0xff] }
  0x37   :  { %v4352_v5 = vpack.c.bf16 %v256_v4, %v255_v3  ;;  %v258_v7 = vld [vmem:[#allocation4 + $0x148] sm:$0xff]  ;;  %v259_v9 = vld [vmem:[#allocation4 + $0x150] sm:$0xff]  ;;  %v260_v10 = vld [vmem:[#allocation4 + $0x158] sm:$0xff] }
  0x38   :  { %v4356_v8 = vpack.c.bf16 %v258_v7, %v257_v6  ;;  %v4360_v11 = vpack.c.bf16 %v260_v10, %v259_v9  ;;  %v261_v12 = vld [vmem:[#allocation4 + $0x160] sm:$0xff]  ;;  %v262_v13 = vld [vmem:[#allocation4 + $0x168] sm:$0xff]  ;;  %v263_v15 = vld [vmem:[#allocation4 + $0x170] sm:$0xff] }
  0x39   :  { %4295 = vmatpush3.bf16.msra.mxu0 %v4292_v16  ;;  %4551 = vmatpush3.bf16.msra.mxu1 %v4292_v16  ;;  %v4364_v14 = vpack.c.bf16 %v262_v13, %v261_v12  ;;  %v264_v16 = vld [vmem:[#allocation4 + $0x178] sm:$0xff]  ;;  %v347_v18 = vld [vmem:[#allocation4 + $0x180] sm:$0xff]  ;;  %v349_v21 = vld [vmem:[#allocation4 + $0x190] sm:$0xff] }
  0x3a   :  { %4297 = vmatprep.subr.bf16.mxu0 %v4296_v19  ;;  %4553 = vmatprep.subr.bf16.mxu1 %v4296_v19  ;;  %v4368_v17 = vpack.c.bf16 %v264_v16, %v263_v15  ;;  %v2739_v23 = vld [vmem:[%s5741_s0 + $0x22] ss:$4 sm:$0x7f]  ;;  %v2757_v29 = vld [vmem:[%s5741_s0 + $0x43] ss:$4 sm:$0xff] }
  0x3b   :  { %v2756_v24 = vld [vmem:[%s5741_s0 + $0x62] ss:$4 sm:$0x7f]  ;;  %v2741_v51 = vld [vmem:[%s5741_s0 + $0x23] ss:$4 sm:$0x7f] }
  0x3c   :  { %v351_v26 = vld [vmem:[#allocation4 + $0x1a0] sm:$0xff]  ;;  %v352_v27 = vld [vmem:[#allocation4 + $0x1a8] sm:$0xff]  ;;  %v361_v43 = vld [vmem:[#allocation4 + $0x1f0] sm:$0xff] }
  0x3d   :  { %4299 = vmatpush3.bf16.msra.mxu0 %v4296_v19  ;;  %4555 = vmatpush3.bf16.msra.mxu1 %v4296_v19  ;;  %v348_v19 = vld [vmem:[#allocation4 + $0x188] sm:$0xff]  ;;  %v4380_v30 = vpack.c.bf16 %v352_v27, %v351_v26  ;;  %v355_v34 = vld [vmem:[#allocation4 + $0x1c0] sm:$0xff]  ;;  %v447_v49 = vld [vmem:[#allocation4 + $0x210] sm:$0xff] }
  0x3e   :  { %4301 = vmatprep.subr.bf16.mxu0 %v4300_v22  ;;  %4557 = vmatprep.subr.bf16.mxu1 %v4300_v22  ;;  %v4372_v20 = vpack.c.bf16 %v348_v19, %v347_v18  ;;  %v356_v35 = vld [vmem:[#allocation4 + $0x1c8] sm:$0xff]  ;;  %v359_v40 = vld [vmem:[#allocation4 + $0x1e0] sm:$0xff]  ;;  %v459_v7 = vld [vmem:[#allocation4 + $0x270] sm:$0xff] }
  0x3f   :  { %v445_v46 = vld [vmem:[#allocation4 + $0x200] sm:$0xff]  ;;  %v450_v55 = vld [vmem:[#allocation4 + $0x228] sm:$0xff]  ;;  %v545_v13 = vld [vmem:[#allocation4 + $0x290] sm:$0xff] }
  0x40   :  { %v2758_v52 = vld [vmem:[%s5741_s0 + $0x63] ss:$4 sm:$0x7f]  ;;  %v2759_v57 = vld [vmem:[%s5741_s0 + $0x44] ss:$4 sm:$0xff] }
  0x41   :  { %4303 = vmatpush3.bf16.msra.mxu0 %v4300_v22  ;;  %4559 = vmatpush3.bf16.msra.mxu1 %v4300_v22  ;;  %v350_v22 = vld [vmem:[#allocation4 + $0x198] sm:$0xff]  ;;  %v449_v54 = vld [vmem:[#allocation4 + $0x220] sm:$0xff]  ;;  %v454_v63 = vld [vmem:[#allocation4 + $0x248] sm:$0xff] }
  0x42   :  { %4305 = vmatprep.subr.bf16.mxu0 %v4304_v25  ;;  %4561 = vmatprep.subr.bf16.mxu1 %v4304_v25  ;;  %v4412_v58 = vpack.c.bf16 %v450_v55, %v449_v54  ;;  %v453_v62 = vld [vmem:[#allocation4 + $0x240] sm:$0xff]  ;;  %v548_v19 = vld [vmem:[#allocation4 + $0x2a8] sm:$0xff] }
  0x43   :  { %v457_v4 = vld [vmem:[#allocation4 + $0x260] sm:$0xff]  ;;  %v552_v27 = vld [vmem:[#allocation4 + $0x2c8] sm:$0xff] }
  0x44   :  { %v543_v10 = vld [vmem:[#allocation4 + $0x280] sm:$0xff]  ;;  %v650_v55 = vld [vmem:[#allocation4 + $0x348] sm:$0xff] }
  0x45   :  { %4307 = vmatpush3.bf16.msra.mxu0 %v4304_v25  ;;  %4563 = vmatpush3.bf16.msra.mxu1 %v4304_v25  ;;  %v4376_v25 = vpack.c.bf16 %v350_v22, %v349_v21  ;;  %v2743_v15 = vld [vmem:[%s5741_s0 + $0x24] ss:$4 sm:$0x7f]  ;;  %v2761_v21 = vld [vmem:[%s5741_s0 + $0x45] ss:$4 sm:$0xff] }
  0x46   :  { %4309 = vmatprep.subr.bf16.mxu0 %v4308_v28  ;;  %4565 = vmatprep.subr.bf16.mxu1 %v4308_v28  ;;  %v2760_v16 = vld [vmem:[%s5741_s0 + $0x64] ss:$4 sm:$0x7f] }
  0x47   :  { %v547_v18 = vld [vmem:[#allocation4 + $0x2a0] sm:$0xff] }
  0x48   :  { %3329 = vmatmul.mubr.f32.vlgmr.msra.gmra.mrb[0].mxu0 %v2737_v31  ;;  %3609 = vmatmul.mubr.f32.vlgmr.msra.gmra.mrb[0].mxu1 %v2754_v32  ;;  %v353_v31 = vld [vmem:[#allocation4 + $0x1b0] sm:$0xff]  ;;  %v354_v32 = vld [vmem:[#allocation4 + $0x1b8] sm:$0xff]  ;;  %v4444_v22 = vpack.c.bf16 %v548_v19, %v547_v18  ;;  %v551_v26 = vld [vmem:[#allocation4 + $0x2c0] sm:$0xff] }
  0x49   :  { %4311 = vmatpush3.bf16.msra.mxu0 %v4308_v28  ;;  %4567 = vmatpush3.bf16.msra.mxu1 %v4308_v28  ;;  %v2740_v28 = vld [vmem:[%s5741_s0 + $0x3] ss:$4 sm:$0xff] }
  0x4a   :  { %4313 = vmatprep.subr.bf16.mxu0 %v4312_v33  ;;  %4569 = vmatprep.subr.bf16.mxu1 %v4312_v33  ;;  %v649_v54 = vld [vmem:[#allocation4 + $0x340] sm:$0xff]  ;;  %v748_v19 = vld [vmem:[#allocation4 + $0x3c8] sm:$0xff] }
  0x4b   :  { %3363 = vmatprep.mubr.f32.mxu0 %v54_v36  ;;  %3643 = vmatprep.mubr.f32.mxu1 %v2751_v37  ;;  %v4388_v36 = vpack.c.bf16 %v356_v35, %v355_v34  ;;  %v357_v37 = vld [vmem:[#allocation4 + $0x1d0] sm:$0xff]  ;;  %v747_v18 = vld [vmem:[#allocation4 + $0x3c0] sm:$0xff] }
  0x4c   :  { %v557_v35 = vld [vmem:[#allocation4 + $0x2f0] sm:$0xff] }
  0x4d   :  { %4315 = vmatpush3.bf16.msra.mxu0 %v4312_v33  ;;  %4571 = vmatpush3.bf16.msra.mxu1 %v4312_v33  ;;  %v4384_v33 = vpack.c.bf16 %v354_v32, %v353_v31  ;;  %v555_v32 = vld [vmem:[#allocation4 + $0x2e0] sm:$0xff] }
  0x4e   :  { %4317 = vmatprep.subr.bf16.mxu0 %v4316_v38  ;;  %4573 = vmatprep.subr.bf16.mxu1 %v4316_v38 }
  0x51   :  { %4319 = vmatpush3.bf16.msra.mxu0 %v4316_v38  ;;  %4575 = vmatpush3.bf16.msra.mxu1 %v4316_v38  ;;  %v358_v38 = vld [vmem:[#allocation4 + $0x1d8] sm:$0xff] }
  0x52   :  { %4321 = vmatprep.subr.bf16.mxu0 %v4320_v41  ;;  %4577 = vmatprep.subr.bf16.mxu1 %v4320_v41  ;;  %v4392_v39 = vpack.c.bf16 %v358_v38, %v357_v37  ;;  %v641_v38 = vld [vmem:[#allocation4 + $0x300] sm:$0xff] }
  0x55   :  { %4323 = vmatpush3.bf16.msra.mxu0 %v4320_v41  ;;  %4579 = vmatpush3.bf16.msra.mxu1 %v4320_v41  ;;  %v360_v41 = vld [vmem:[#allocation4 + $0x1e8] sm:$0xff] }
  0x56   :  { %4325 = vmatprep.subr.bf16.mxu0 %v4324_v44  ;;  %4581 = vmatprep.subr.bf16.mxu1 %v4324_v44  ;;  %v4396_v42 = vpack.c.bf16 %v360_v41, %v359_v40  ;;  %v643_v41 = vld [vmem:[#allocation4 + $0x310] sm:$0xff] }
  0x59   :  { %4327 = vmatpush3.bf16.msra.mxu0 %v4324_v44  ;;  %4583 = vmatpush3.bf16.msra.mxu1 %v4324_v44  ;;  %v362_v44 = vld [vmem:[#allocation4 + $0x1f8] sm:$0xff] }
  0x5a   :  { %4329 = vmatprep.subr.bf16.mxu0 %v4328_v47  ;;  %4585 = vmatprep.subr.bf16.mxu1 %v4328_v47  ;;  %v4400_v45 = vpack.c.bf16 %v362_v44, %v361_v43  ;;  %v2745_v43 = vld [vmem:[%s5741_s0 + $0x25] ss:$4 sm:$0x7f] }
  0x5b   :  { %v2762_v44 = vld [vmem:[%s5741_s0 + $0x65] ss:$4 sm:$0x7f] }
  0x5d   :  { %4331 = vmatpush3.bf16.msra.mxu0 %v4328_v47  ;;  %4587 = vmatpush3.bf16.msra.mxu1 %v4328_v47  ;;  %v446_v47 = vld [vmem:[#allocation4 + $0x208] sm:$0xff] }
  0x5e   :  { %4333 = vmatprep.subr.bf16.mxu0 %v4332_v50  ;;  %4589 = vmatprep.subr.bf16.mxu1 %v4332_v50  ;;  %v4404_v48 = vpack.c.bf16 %v446_v47, %v445_v46  ;;  %v645_v46 = vld [vmem:[#allocation4 + $0x320] sm:$0xff]  ;;  %v646_v47 = vld [vmem:[#allocation4 + $0x328] sm:$0xff] }
  0x61   :  { %4335 = vmatpush3.bf16.msra.mxu0 %v4332_v50  ;;  %4591 = vmatpush3.bf16.msra.mxu1 %v4332_v50  ;;  %v448_v50 = vld [vmem:[#allocation4 + $0x218] sm:$0xff] }
  0x62   :  { %4337 = vmatprep.subr.bf16.mxu0 %v4336_v53  ;;  %4593 = vmatprep.subr.bf16.mxu1 %v4336_v53 }
  0x65   :  { %4339 = vmatpush3.bf16.msra.mxu0 %v4336_v53  ;;  %4595 = vmatpush3.bf16.msra.mxu1 %v4336_v53  ;;  %v4408_v53 = vpack.c.bf16 %v448_v50, %v447_v49  ;;  %v2763_v49 = vld [vmem:[%s5741_s0 + $0x46] ss:$4 sm:$0xff]  ;;  %v4476_v50 = vpack.c.bf16 %v646_v47, %v645_v46 }
  0x66   :  { %4341 = vmatprep.subr.bf16.mxu0 %v4340_v56  ;;  %4597 = vmatprep.subr.bf16.mxu1 %v4340_v56  ;;  %v1655_v46 = vld [vmem:[#allocation6 + $0xa8] sm:$0xff]  ;;  %v1635_v47 = vld [vmem:[#allocation6 + $0x20] sm:$0xff] }
  0x68   :  { %3364 = vmatmul.mubr.f32.vlgmr.msra.gmra.mrb[0].mxu0 %v2735_v59  ;;  %3644 = vmatmul.mubr.f32.vlgmr.msra.gmra.mrb[0].mxu1 %v2752_v60  ;;  %v451_v59 = vld [vmem:[#allocation4 + $0x230] sm:$0xff]  ;;  %v452_v60 = vld [vmem:[#allocation4 + $0x238] sm:$0xff] }
  0x69   :  { %4343 = vmatpush3.bf16.msra.mxu0 %v4340_v56  ;;  %4599 = vmatpush3.bf16.msra.mxu1 %v4340_v56  ;;  %v2742_v56 = vld [vmem:[%s5741_s0 + $0x4] ss:$4 sm:$0xff] }
  0x6a   :  { %4345 = vmatprep.subr.bf16.mxu0 %v4344_v61  ;;  %4601 = vmatprep.subr.bf16.mxu1 %v4344_v61 }
  0x6b   :  { %3398 = vmatprep.mubr.f32.mxu0 %v2738_v0  ;;  %3678 = vmatprep.mubr.f32.mxu1 %v2755_v1  ;;  %v4420_v0 = vpack.c.bf16 %v454_v63, %v453_v62  ;;  %v455_v1 = vld [vmem:[#allocation4 + $0x250] sm:$0xff] }
  0x6c   :  { %v655_v63 = vld [vmem:[#allocation4 + $0x370] sm:$0xff] }
  0x6d   :  { %4347 = vmatpush3.bf16.msra.mxu0 %v4344_v61  ;;  %4603 = vmatpush3.bf16.msra.mxu1 %v4344_v61  ;;  %v4416_v61 = vpack.c.bf16 %v452_v60, %v451_v59  ;;  %v653_v60 = vld [vmem:[#allocation4 + $0x360] sm:$0xff] }
  0x6e   :  { %4349 = vmatprep.subr.bf16.mxu0 %v4348_v2  ;;  %4605 = vmatprep.subr.bf16.mxu1 %v4348_v2 }
  0x71   :  { %4351 = vmatpush3.bf16.msra.mxu0 %v4348_v2  ;;  %4607 = vmatpush3.bf16.msra.mxu1 %v4348_v2  ;;  %v456_v2 = vld [vmem:[#allocation4 + $0x258] sm:$0xff] }
  0x72   :  { %4353 = vmatprep.subr.bf16.mxu0 %v4352_v5  ;;  %4609 = vmatprep.subr.bf16.mxu1 %v4352_v5  ;;  %v4424_v3 = vpack.c.bf16 %v456_v2, %v455_v1  ;;  %v739_v2 = vld [vmem:[#allocation4 + $0x380] sm:$0xff] }
  0x75   :  { %4355 = vmatpush3.bf16.msra.mxu0 %v4352_v5  ;;  %4611 = vmatpush3.bf16.msra.mxu1 %v4352_v5  ;;  %v458_v5 = vld [vmem:[#allocation4 + $0x268] sm:$0xff] }
  0x76   :  { %4357 = vmatprep.subr.bf16.mxu0 %v4356_v8  ;;  %4613 = vmatprep.subr.bf16.mxu1 %v4356_v8  ;;  %v4428_v6 = vpack.c.bf16 %v458_v5, %v457_v4  ;;  %v741_v5 = vld [vmem:[#allocation4 + $0x390] sm:$0xff] }
  0x79   :  { %4359 = vmatpush3.bf16.msra.mxu0 %v4356_v8  ;;  %4615 = vmatpush3.bf16.msra.mxu1 %v4356_v8  ;;  %v460_v8 = vld [vmem:[#allocation4 + $0x278] sm:$0xff] }
  0x7a   :  { %4361 = vmatprep.subr.bf16.mxu0 %v4360_v11  ;;  %4617 = vmatprep.subr.bf16.mxu1 %v4360_v11  ;;  %v4432_v9 = vpack.c.bf16 %v460_v8, %v459_v7  ;;  %v2747_v7 = vld [vmem:[%s5741_s0 + $0x26] ss:$4 sm:$0x7f] }
  0x7b   :  { %v2764_v8 = vld [vmem:[%s5741_s0 + $0x66] ss:$4 sm:$0x7f] }
  0x7d   :  { %4363 = vmatpush3.bf16.msra.mxu0 %v4360_v11  ;;  %4619 = vmatpush3.bf16.msra.mxu1 %v4360_v11  ;;  %v544_v11 = vld [vmem:[#allocation4 + $0x288] sm:$0xff] }
  0x7e   :  { %4365 = vmatprep.subr.bf16.mxu0 %v4364_v14  ;;  %4621 = vmatprep.subr.bf16.mxu1 %v4364_v14  ;;  %v4436_v12 = vpack.c.bf16 %v544_v11, %v543_v10  ;;  %v743_v10 = vld [vmem:[#allocation4 + $0x3a0] sm:$0xff]  ;;  %v744_v11 = vld [vmem:[#allocation4 + $0x3a8] sm:$0xff] }
  0x81   :  { %4367 = vmatpush3.bf16.msra.mxu0 %v4364_v14  ;;  %4623 = vmatpush3.bf16.msra.mxu1 %v4364_v14  ;;  %v546_v14 = vld [vmem:[#allocation4 + $0x298] sm:$0xff] }
  0x82   :  { %4369 = vmatprep.subr.bf16.mxu0 %v4368_v17  ;;  %4625 = vmatprep.subr.bf16.mxu1 %v4368_v17 }
  0x85   :  { %4371 = vmatpush3.bf16.msra.mxu0 %v4368_v17  ;;  %4627 = vmatpush3.bf16.msra.mxu1 %v4368_v17  ;;  %v4440_v17 = vpack.c.bf16 %v546_v14, %v545_v13  ;;  %v2765_v13 = vld [vmem:[%s5741_s0 + $0x47] ss:$4 sm:$0xff]  ;;  %v4508_v14 = vpack.c.bf16 %v744_v11, %v743_v10 }
  0x86   :  { %4373 = vmatprep.subr.bf16.mxu0 %v4372_v20  ;;  %4629 = vmatprep.subr.bf16.mxu1 %v4372_v20  ;;  %v1664_v11 = vld [vmem:[#allocation6 + $0xf0] sm:$0xff] }
  0x88   :  { %3399 = vmatmul.mubr.f32.vlgmr.msra.gmra.mrb[0].mxu0 %v2739_v23  ;;  %3679 = vmatmul.mubr.f32.vlgmr.msra.gmra.mrb[0].mxu1 %v2756_v24  ;;  %v549_v23 = vld [vmem:[#allocation4 + $0x2b0] sm:$0xff]  ;;  %v550_v24 = vld [vmem:[#allocation4 + $0x2b8] sm:$0xff] }
  0x89   :  { %4375 = vmatpush3.bf16.msra.mxu0 %v4372_v20  ;;  %4631 = vmatpush3.bf16.msra.mxu1 %v4372_v20  ;;  %v2744_v20 = vld [vmem:[%s5741_s0 + $0x5] ss:$4 sm:$0xff] }
  0x8a   :  { %4377 = vmatprep.subr.bf16.mxu0 %v4376_v25  ;;  %4633 = vmatprep.subr.bf16.mxu1 %v4376_v25 }
  0x8b   :  { %3433 = vmatprep.mubr.f32.mxu0 %v2740_v28  ;;  %3713 = vmatprep.mubr.f32.mxu1 %v2757_v29  ;;  %v4452_v28 = vpack.c.bf16 %v552_v27, %v551_v26  ;;  %v553_v29 = vld [vmem:[#allocation4 + $0x2d0] sm:$0xff] }
  0x8c   :  { %v753_v27 = vld [vmem:[#allocation4 + $0x3f0] sm:$0xff] }
  0x8d   :  { %4379 = vmatpush3.bf16.msra.mxu0 %v4376_v25  ;;  %4635 = vmatpush3.bf16.msra.mxu1 %v4376_v25  ;;  %v4448_v25 = vpack.c.bf16 %v550_v24, %v549_v23  ;;  %v751_v24 = vld [vmem:[#allocation4 + $0x3e0] sm:$0xff] }
  0x8e   :  { %4381 = vmatprep.subr.bf16.mxu0 %v4380_v30  ;;  %4637 = vmatprep.subr.bf16.mxu1 %v4380_v30 }
  0x91   :  { %4383 = vmatpush3.bf16.msra.mxu0 %v4380_v30  ;;  %4639 = vmatpush3.bf16.msra.mxu1 %v4380_v30  ;;  %v554_v30 = vld [vmem:[#allocation4 + $0x2d8] sm:$0xff] }
  0x92   :  { %4385 = vmatprep.subr.bf16.mxu0 %v4384_v33  ;;  %4641 = vmatprep.subr.bf16.mxu1 %v4384_v33  ;;  %v4456_v31 = vpack.c.bf16 %v554_v30, %v553_v29  ;;  %v1650_v30 = vld [vmem:[#allocation6 + $0x80] sm:$0xff] }
  0x95   :  { %4387 = vmatpush3.bf16.msra.mxu0 %v4384_v33  ;;  %4643 = vmatpush3.bf16.msra.mxu1 %v4384_v33  ;;  %v556_v33 = vld [vmem:[#allocation4 + $0x2e8] sm:$0xff] }
  0x96   :  { %4389 = vmatprep.subr.bf16.mxu0 %v4388_v36  ;;  %4645 = vmatprep.subr.bf16.mxu1 %v4388_v36  ;;  %v4460_v34 = vpack.c.bf16 %v556_v33, %v555_v32  ;;  %v1631_v32 = vld [vmem:[#allocation6] sm:$0xff]  ;;  %v1632_v33 = vld [vmem:[#allocation6 + $0x8] sm:$0xff] }
  0x99   :  { %4391 = vmatpush3.bf16.msra.mxu0 %v4388_v36  ;;  %4647 = vmatpush3.bf16.msra.mxu1 %v4388_v36  ;;  %v558_v36 = vld [vmem:[#allocation4 + $0x2f8] sm:$0xff] }
  0x9a   :  { %4393 = vmatprep.subr.bf16.mxu0 %v4392_v39  ;;  %4649 = vmatprep.subr.bf16.mxu1 %v4392_v39  ;;  %v4464_v37 = vpack.c.bf16 %v558_v36, %v557_v35  ;;  %v2766_v35 = vld [vmem:[%s5741_s0 + $0x67] ss:$4 sm:$0x7f] }
  0x9d   :  { %4395 = vmatpush3.bf16.msra.mxu0 %v4392_v39  ;;  %4651 = vmatpush3.bf16.msra.mxu1 %v4392_v39  ;;  %v642_v39 = vld [vmem:[#allocation4 + $0x308] sm:$0xff] }
  0x9e   :  { %4397 = vmatprep.subr.bf16.mxu0 %v4396_v42  ;;  %4653 = vmatprep.subr.bf16.mxu1 %v4396_v42  ;;  %v4468_v40 = vpack.c.bf16 %v642_v39, %v641_v38  ;;  %v1652_v38 = vld [vmem:[#allocation6 + $0x90] sm:$0xff]  ;;  %v5163_v39 = vmov 0.0|0.0  }
  0xa1   :  { %4399 = vmatpush3.bf16.msra.mxu0 %v4396_v42  ;;  %4655 = vmatpush3.bf16.msra.mxu1 %v4396_v42  ;;  %v644_v42 = vld [vmem:[#allocation4 + $0x318] sm:$0xff] }
  0xa2   :  { %4401 = vmatprep.subr.bf16.mxu0 %v4400_v45  ;;  %4657 = vmatprep.subr.bf16.mxu1 %v4400_v45 }
  0xa5   :  { %4403 = vmatpush3.bf16.msra.mxu0 %v4400_v45  ;;  %4659 = vmatpush3.bf16.msra.mxu1 %v4400_v45  ;;  %v4472_v45 = vpack.c.bf16 %v644_v42, %v643_v41  ;;  %v1633_v41 = vld [vmem:[#allocation6 + $0x10] sm:$0xff]  ;;  %v1634_v42 = vld [vmem:[#allocation6 + $0x18] sm:$0xff] }
  0xa6   :  { %4405 = vmatprep.subr.bf16.mxu0 %v4404_v48  ;;  %4661 = vmatprep.subr.bf16.mxu1 %v4404_v48 }
  0xa8   :  { %3434 = vmatmul.mubr.f32.vlgmr.msra.gmra.mrb[0].mxu0 %v2741_v51  ;;  %3714 = vmatmul.mubr.f32.vlgmr.msra.gmra.mrb[0].mxu1 %v2758_v52  ;;  %v647_v51 = vld [vmem:[#allocation4 + $0x330] sm:$0xff]  ;;  %v648_v52 = vld [vmem:[#allocation4 + $0x338] sm:$0xff] }
  0xa9   :  { %4407 = vmatpush3.bf16.msra.mxu0 %v4404_v48  ;;  %4663 = vmatpush3.bf16.msra.mxu1 %v4404_v48  ;;  %v2746_v48 = vld [vmem:[%s5741_s0 + $0x6] ss:$4 sm:$0xff] }
  0xaa   :  { %4409 = vmatprep.subr.bf16.mxu0 %v4408_v53  ;;  %4665 = vmatprep.subr.bf16.mxu1 %v4408_v53 }
  0xab   :  { %3468 = vmatprep.mubr.f32.mxu0 %v2742_v56  ;;  %3748 = vmatprep.mubr.f32.mxu1 %v2759_v57  ;;  %v4484_v56 = vpack.c.bf16 %v650_v55, %v649_v54  ;;  %v651_v57 = vld [vmem:[#allocation4 + $0x350] sm:$0xff]  ;;  %v1638_v54 = vld [vmem:[#allocation6 + $0x38] sm:$0xff] }
  0xad   :  { %4411 = vmatpush3.bf16.msra.mxu0 %v4408_v53  ;;  %4667 = vmatpush3.bf16.msra.mxu1 %v4408_v53  ;;  %v4480_v53 = vpack.c.bf16 %v648_v52, %v647_v51  ;;  %v1656_v51 = vld [vmem:[#allocation6 + $0xb0] sm:$0xff]  ;;  %v1657_v52 = vld [vmem:[#allocation6 + $0xb8] sm:$0xff] }
  0xae   :  { %4413 = vmatprep.subr.bf16.mxu0 %v4412_v58  ;;  %4669 = vmatprep.subr.bf16.mxu1 %v4412_v58  ;;  %v5350_v55 = vpack.c.bf16 %v1657_v52, %v1656_v51  ;;  %v1813_v52 = vld [vmem:[#allocation6 + $0x120] sm:$0xff] }
  0xb1   :  { %4415 = vmatpush3.bf16.msra.mxu0 %v4412_v58  ;;  %4671 = vmatpush3.bf16.msra.mxu1 %v4412_v58  ;;  %v652_v58 = vld [vmem:[#allocation4 + $0x358] sm:$0xff] }
  0xb2   :  { %4417 = vmatprep.subr.bf16.mxu0 %v4416_v61  ;;  %4673 = vmatprep.subr.bf16.mxu1 %v4416_v61  ;;  %v4488_v59 = vpack.c.bf16 %v652_v58, %v651_v57  ;;  %v1658_v57 = vld [vmem:[#allocation6 + $0xc0] sm:$0xff]  ;;  %v1659_v58 = vld [vmem:[#allocation6 + $0xc8] sm:$0xff] }
  0xb5   :  { %4419 = vmatpush3.bf16.msra.mxu0 %v4416_v61  ;;  %4675 = vmatpush3.bf16.msra.mxu1 %v4416_v61  ;;  %v654_v61 = vld [vmem:[#allocation4 + $0x368] sm:$0xff] }
  0xb6   :  { %4421 = vmatprep.subr.bf16.mxu0 %v4420_v0  ;;  %4677 = vmatprep.subr.bf16.mxu1 %v4420_v0  ;;  %v4492_v62 = vpack.c.bf16 %v654_v61, %v653_v60  ;;  %v1640_v60 = vld [vmem:[#allocation6 + $0x48] sm:$0xff]  ;;  %v5358_v61 = vpack.c.bf16 %v1659_v58, %v1658_v57 }
  0xb7   :  { %v1904_v57 = vld [vmem:[#allocation6 + $0x1a8] sm:$0xff] }
  0xb9   :  { %4423 = vmatpush3.bf16.msra.mxu0 %v4420_v0  ;;  %4679 = vmatpush3.bf16.msra.mxu1 %v4420_v0  ;;  %v656_v0 = vld [vmem:[#allocation4 + $0x378] sm:$0xff] }
  0xba   :  { %4425 = vmatprep.subr.bf16.mxu0 %v4424_v3  ;;  %4681 = vmatprep.subr.bf16.mxu1 %v4424_v3  ;;  %v4496_v1 = vpack.c.bf16 %v656_v0, %v655_v63  ;;  %v1660_v63 = vld [vmem:[#allocation6 + $0xd0] sm:$0xff]  ;;  %v1661_v0 = vld [vmem:[#allocation6 + $0xd8] sm:$0xff] }
  0xbd   :  { %4427 = vmatpush3.bf16.msra.mxu0 %v4424_v3  ;;  %4683 = vmatpush3.bf16.msra.mxu1 %v4424_v3  ;;  %v740_v3 = vld [vmem:[#allocation4 + $0x388] sm:$0xff] }
  0xbe   :  { %4429 = vmatprep.subr.bf16.mxu0 %v4428_v6  ;;  %4685 = vmatprep.subr.bf16.mxu1 %v4428_v6  ;;  %v4500_v4 = vpack.c.bf16 %v740_v3, %v739_v2  ;;  %v5368_v2 = vpack.c.bf16 %v1661_v0, %v1660_v63  ;;  %v1642_v3 = vld [vmem:[#allocation6 + $0x58] sm:$0xff]  ;;  %v1905_v0 = vld [vmem:[#allocation6 + $0x1b0] sm:$0xff] }
  0xbf   :  { %v1816_v63 = vld [vmem:[#allocation6 + $0x138] sm:$0xff] }
  0xc1   :  { %4431 = vmatpush3.bf16.msra.mxu0 %v4428_v6  ;;  %4687 = vmatpush3.bf16.msra.mxu1 %v4428_v6  ;;  %v742_v6 = vld [vmem:[#allocation4 + $0x398] sm:$0xff] }
  0xc2   :  { %4433 = vmatprep.subr.bf16.mxu0 %v4432_v9  ;;  %4689 = vmatprep.subr.bf16.mxu1 %v4432_v9 }
  0xc5   :  { %4435 = vmatpush3.bf16.msra.mxu0 %v4432_v9  ;;  %4691 = vmatpush3.bf16.msra.mxu1 %v4432_v9  ;;  %v4504_v9 = vpack.c.bf16 %v742_v6, %v741_v5  ;;  %v1662_v5 = vld [vmem:[#allocation6 + $0xe0] sm:$0xff]  ;;  %v1663_v6 = vld [vmem:[#allocation6 + $0xe8] sm:$0xff] }
  0xc6   :  { %4437 = vmatprep.subr.bf16.mxu0 %v4436_v12  ;;  %4693 = vmatprep.subr.bf16.mxu1 %v4436_v12 }
  0xc8   :  { %3469 = vmatmul.mubr.f32.vlgmr.msra.gmra.mrb[0].mxu0 %v2743_v15  ;;  %3749 = vmatmul.mubr.f32.vlgmr.msra.gmra.mrb[0].mxu1 %v2760_v16  ;;  %v745_v15 = vld [vmem:[#allocation4 + $0x3b0] sm:$0xff]  ;;  %v746_v16 = vld [vmem:[#allocation4 + $0x3b8] sm:$0xff] }
  0xc9   :  { %4439 = vmatpush3.bf16.msra.mxu0 %v4436_v12  ;;  %4695 = vmatpush3.bf16.msra.mxu1 %v4436_v12  ;;  %v2748_v12 = vld [vmem:[%s5741_s0 + $0x7] ss:$4 sm:$0xff] }
  0xca   :  { %4441 = vmatprep.subr.bf16.mxu0 %v4440_v17  ;;  %4697 = vmatprep.subr.bf16.mxu1 %v4440_v17 }
  0xcb   :  { %3503 = vmatprep.mubr.f32.mxu0 %v2744_v20  ;;  %3783 = vmatprep.mubr.f32.mxu1 %v2761_v21  ;;  %v4516_v20 = vpack.c.bf16 %v748_v19, %v747_v18  ;;  %v749_v21 = vld [vmem:[#allocation4 + $0x3d0] sm:$0xff] }
  0xcc   :  { %v2750_v18 = vld [vmem:[%s5743_s2] ss:$0 sm:$0xff] }
  0xcd   :  { %4443 = vmatpush3.bf16.msra.mxu0 %v4440_v17  ;;  %4699 = vmatpush3.bf16.msra.mxu1 %v4440_v17  ;;  %v4512_v17 = vpack.c.bf16 %v746_v16, %v745_v15  ;;  %v1646_v15 = vld [vmem:[#allocation6 + $0x78] sm:$0xff] }
  0xce   :  { %4445 = vmatprep.subr.bf16.mxu0 %v4444_v22  ;;  %4701 = vmatprep.subr.bf16.mxu1 %v4444_v22 }
  0xd1   :  { %4447 = vmatpush3.bf16.msra.mxu0 %v4444_v22  ;;  %4703 = vmatpush3.bf16.msra.mxu1 %v4444_v22  ;;  %v750_v22 = vld [vmem:[#allocation4 + $0x3d8] sm:$0xff] }
  0xd2   :  { %4449 = vmatprep.subr.bf16.mxu0 %v4448_v25  ;;  %4705 = vmatprep.subr.bf16.mxu1 %v4448_v25  ;;  %v4520_v23 = vpack.c.bf16 %v750_v22, %v749_v21 }
  0xd5   :  { %4451 = vmatpush3.bf16.msra.mxu0 %v4448_v25  ;;  %4707 = vmatpush3.bf16.msra.mxu1 %v4448_v25  ;;  %v752_v25 = vld [vmem:[#allocation4 + $0x3e8] sm:$0xff] }
  0xd6   :  { %4453 = vmatprep.subr.bf16.mxu0 %v4452_v28  ;;  %4709 = vmatprep.subr.bf16.mxu1 %v4452_v28  ;;  %v4524_v26 = vpack.c.bf16 %v752_v25, %v751_v24 }
  0xd9   :  { %4455 = vmatpush3.bf16.msra.mxu0 %v4452_v28  ;;  %4711 = vmatpush3.bf16.msra.mxu1 %v4452_v28  ;;  %v754_v28 = vld [vmem:[#allocation4 + $0x3f8] sm:$0xff] }
  0xda   :  { %4457 = vmatprep.subr.bf16.mxu0 %v4456_v31  ;;  %4713 = vmatprep.subr.bf16.mxu1 %v4456_v31  ;;  %v4528_v29 = vpack.c.bf16 %v754_v28, %v753_v27 }
  0xdd   :  { %4459 = vmatpush3.bf16.msra.mxu0 %v4456_v31  ;;  %4715 = vmatpush3.bf16.msra.mxu1 %v4456_v31  ;;  %v1651_v31 = vld [vmem:[#allocation6 + $0x88] sm:$0xff] }
  0xde   :  { %4461 = vmatprep.subr.bf16.mxu0 %v4460_v34  ;;  %4717 = vmatprep.subr.bf16.mxu1 %v4460_v34  ;;  %v5326_v36 = vpack.c.bf16 %v1651_v31, %v1650_v30  ;;  %v1809_v31 = vld [vmem:[#allocation6 + $0x100] sm:$0xff] }
  0xe1   :  { %4463 = vmatpush3.bf16.msra.mxu0 %v4460_v34  ;;  %4719 = vmatpush3.bf16.msra.mxu1 %v4460_v34  ;;  %v2749_v34 = vld [vmem:[%s5741_s0 + $0x27] ss:$4 sm:$0x7f] }
  0xe2   :  { %4465 = vmatprep.subr.bf16.mxu0 %v4464_v37  ;;  %4721 = vmatprep.subr.bf16.mxu1 %v4464_v37 }
  0xe5   :  { %4467 = vmatpush3.bf16.msra.mxu0 %v4464_v37  ;;  %4723 = vmatpush3.bf16.msra.mxu1 %v4464_v37  ;;  %v5328_v37 = vpack.c.bf16 %v1632_v33, %v1631_v32  ;;  %v1810_v32 = vld [vmem:[#allocation6 + $0x108] sm:$0xff]  ;;  %v1899_v33 = vld [vmem:[#allocation6 + $0x180] sm:$0xff] }
  0xe6   :  { %4469 = vmatprep.subr.bf16.mxu0 %v4468_v40  ;;  %4725 = vmatprep.subr.bf16.mxu1 %v4468_v40 }
  0xe8   :  { %3504 = vmatmul.mubr.f32.vlgmr.msra.gmra.mrb[0].mxu0 %v2745_v43  ;;  %3784 = vmatmul.mubr.f32.vlgmr.msra.gmra.mrb[0].mxu1 %v2762_v44  ;;  %v5336_v44 = vpack.c.bf16 %v1634_v42, %v1633_v41  ;;  %v1812_v41 = vld [vmem:[#allocation6 + $0x118] sm:$0xff]  ;;  %v1901_v42 = vld [vmem:[#allocation6 + $0x190] sm:$0xff] }
  0xe9   :  { %4471 = vmatpush3.bf16.msra.mxu0 %v4468_v40  ;;  %4727 = vmatpush3.bf16.msra.mxu1 %v4468_v40  ;;  %v1653_v40 = vld [vmem:[#allocation6 + $0x98] sm:$0xff] }
  0xea   :  { %4473 = vmatprep.subr.bf16.mxu0 %v4472_v45  ;;  %4729 = vmatprep.subr.bf16.mxu1 %v4472_v45  ;;  %v5334_v43 = vpack.c.bf16 %v1653_v40, %v1652_v38  ;;  %v1811_v40 = vld [vmem:[#allocation6 + $0x110] sm:$0xff] }
  0xeb   :  { %3538 = vmatprep.mubr.f32.mxu0 %v2746_v48  ;;  %3818 = vmatprep.mubr.f32.mxu1 %v2763_v49  ;;  %v1636_v48 = vld [vmem:[#allocation6 + $0x28] sm:$0xff] }
  0xed   :  { %4475 = vmatpush3.bf16.msra.mxu0 %v4472_v45  ;;  %4731 = vmatpush3.bf16.msra.mxu1 %v4472_v45  ;;  %v1654_v45 = vld [vmem:[#allocation6 + $0xa0] sm:$0xff] }
  0xee   :  { %4477 = vmatprep.subr.bf16.mxu0 %v4476_v50  ;;  %4733 = vmatprep.subr.bf16.mxu1 %v4476_v50  ;;  %v5342_v49 = vpack.c.bf16 %v1655_v46, %v1654_v45  ;;  %v1902_v45 = vld [vmem:[#allocation6 + $0x198] sm:$0xff] }
  0xef   :  { %v5407_v51 = vpack.c.bf16 %v1902_v45, %v1901_v42  ;;  %v2365_v42 = vld [vmem:[%s5746_s5 + $0x20] sm:$0xff]  ;;  %v2366_v45 = vld [vmem:[%s5746_s5 + $0x28] sm:$0xff] }
  0xf1   :  { %4479 = vmatpush3.bf16.msra.mxu0 %v4476_v50  ;;  %4735 = vmatpush3.bf16.msra.mxu1 %v4476_v50  ;;  %v5344_v50 = vpack.c.bf16 %v1636_v48, %v1635_v47  ;;  %v5405_v48 = vpack.c.bf16 %v1812_v41, %v1811_v40 }
  0xf2   :  { %4481 = vmatprep.subr.bf16.mxu0 %v4480_v53  ;;  %4737 = vmatprep.subr.bf16.mxu1 %v4480_v53 }
  0xf5   :  { %4483 = vmatpush3.bf16.msra.mxu0 %v4480_v53  ;;  %4739 = vmatpush3.bf16.msra.mxu1 %v4480_v53  ;;  %v1637_v53 = vld [vmem:[#allocation6 + $0x30] sm:$0xff] }
  0xf6   :  { %4485 = vmatprep.subr.bf16.mxu0 %v4484_v56  ;;  %4741 = vmatprep.subr.bf16.mxu1 %v4484_v56 }
  0xf9   :  { %4487 = vmatpush3.bf16.msra.mxu0 %v4484_v56  ;;  %4743 = vmatpush3.bf16.msra.mxu1 %v4484_v56  ;;  %v5352_v56 = vpack.c.bf16 %v1638_v54, %v1637_v53  ;;  %v1814_v53 = vld [vmem:[#allocation6 + $0x128] sm:$0xff]  ;;  %v1903_v54 = vld [vmem:[#allocation6 + $0x1a0] sm:$0xff] }
  0xfa   :  { %4489 = vmatprep.subr.bf16.mxu0 %v4488_v59  ;;  %4745 = vmatprep.subr.bf16.mxu1 %v4488_v59  ;;  %v5417_v58 = vpack.c.bf16 %v1814_v53, %v1813_v52  ;;  %v2367_v52 = vld [vmem:[%s5746_s5 + $0x30] sm:$0xff]  ;;  %v2368_v53 = vld [vmem:[%s5746_s5 + $0x38] sm:$0xff] }
  0xfd   :  { %4491 = vmatpush3.bf16.msra.mxu0 %v4488_v59  ;;  %4747 = vmatpush3.bf16.msra.mxu1 %v4488_v59  ;;  %v1639_v59 = vld [vmem:[#allocation6 + $0x40] sm:$0xff] }
  0xfe   :  { %4493 = vmatprep.subr.bf16.mxu0 %v4492_v62  ;;  %4749 = vmatprep.subr.bf16.mxu1 %v4492_v62 }
 0x101   :  { %4495 = vmatpush3.bf16.msra.mxu0 %v4492_v62  ;;  %4751 = vmatpush3.bf16.msra.mxu1 %v4492_v62  ;;  %v5360_v62 = vpack.c.bf16 %v1640_v60, %v1639_v59  ;;  %v5419_v59 = vpack.c.bf16 %v1904_v57, %v1903_v54  ;;  %v1815_v60 = vld [vmem:[#allocation6 + $0x130] sm:$0xff]  ;;  %v5615_v57 = vpack.c.bf16 %v2368_v53, %v2367_v52 }
 0x102   :  { %4497 = vmatprep.subr.bf16.mxu0 %v4496_v1  ;;  %4753 = vmatprep.subr.bf16.mxu1 %v4496_v1 }
 0x105   :  { %4499 = vmatpush3.bf16.msra.mxu0 %v4496_v1  ;;  %4755 = vmatpush3.bf16.msra.mxu1 %v4496_v1  ;;  %v1641_v1 = vld [vmem:[#allocation6 + $0x50] sm:$0xff] }
 0x106   :  { %4501 = vmatprep.subr.bf16.mxu0 %v4500_v4  ;;  %4757 = vmatprep.subr.bf16.mxu1 %v4500_v4 }
 0x108   :  { %3539 = vmatmul.mubr.f32.vlgmr.msra.gmra.mrb[0].mxu0 %v2747_v7  ;;  %3819 = vmatmul.mubr.f32.vlgmr.msra.gmra.mrb[0].mxu1 %v2764_v8  ;;  %v1643_v7 = vld [vmem:[#allocation6 + $0x60] sm:$0xff]  ;;  %v5376_v8 = vpack.c.bf16 %v1663_v6, %v1662_v5 }
 0x109   :  { %4503 = vmatpush3.bf16.msra.mxu0 %v4500_v4  ;;  %4759 = vmatpush3.bf16.msra.mxu1 %v4500_v4  ;;  %v5370_v4 = vpack.c.bf16 %v1642_v3, %v1641_v1  ;;  %v1906_v1 = vld [vmem:[#allocation6 + $0x1b8] sm:$0xff]  ;;  %v5425_v3 = vpack.c.bf16 %v1816_v63, %v1815_v60  ;;  %v1817_v6 = vld [vmem:[#allocation6 + $0x140] sm:$0xff]  ;;  %v2369_v60 = vld [vmem:[%s5746_s5 + $0x40] sm:$0xff] }
 0x10a   :  { %4505 = vmatprep.subr.bf16.mxu0 %v4504_v9  ;;  %4761 = vmatprep.subr.bf16.mxu1 %v4504_v9  ;;  %v5427_v5 = vpack.c.bf16 %v1906_v1, %v1905_v0  ;;  %v2370_v0 = vld [vmem:[%s5746_s5 + $0x48] sm:$0xff] }
 0x10b   :  { %3573 = vmatprep.mubr.f32.mxu0 %v2748_v12  ;;  %3853 = vmatprep.mubr.f32.mxu1 %v2765_v13  ;;  %v1665_v12 = vld [vmem:[#allocation6 + $0xf8] sm:$0xff]  ;;  %v1645_v13 = vld [vmem:[#allocation6 + $0x70] sm:$0xff]  ;;  %v5637_v1 = vpack.c.bf16 %v2370_v0, %v2369_v60 }
 0x10c   :  { %v5386_v16 = vpack.c.bf16 %v1646_v15, %v1645_v13  ;;  %v1819_v15 = vld [vmem:[#allocation6 + $0x150] sm:$0xff] }
 0x10d   :  { %4507 = vmatpush3.bf16.msra.mxu0 %v4504_v9  ;;  %4763 = vmatpush3.bf16.msra.mxu1 %v4504_v9  ;;  %v1644_v9 = vld [vmem:[#allocation6 + $0x68] sm:$0xff] }
 0x10e   :  { %4509 = vmatprep.subr.bf16.mxu0 %v4508_v14  ;;  %4765 = vmatprep.subr.bf16.mxu1 %v4508_v14  ;;  %v5378_v10 = vpack.c.bf16 %v1644_v9, %v1643_v7  ;;  %v1818_v7 = vld [vmem:[#allocation6 + $0x148] sm:$0xff]  ;;  %v1907_v9 = vld [vmem:[#allocation6 + $0x1c0] sm:$0xff] }
 0x111   :  { %4511 = vmatpush3.bf16.msra.mxu0 %v4508_v14  ;;  %4767 = vmatpush3.bf16.msra.mxu1 %v4508_v14  ;;  %v5383_v14 = vpack.c.bf16 %v1665_v12, %v1664_v11  ;;  %v1908_v11 = vld [vmem:[#allocation6 + $0x1c8] sm:$0xff]  ;;  %v5433_v12 = vpack.c.bf16 %v1818_v7, %v1817_v6  ;;  %v2371_v6 = vld [vmem:[%s5746_s5 + $0x50] sm:$0xff] }
 0x112   :  { %4513 = vmatprep.subr.bf16.mxu0 %v4512_v17  ;;  %4769 = vmatprep.subr.bf16.mxu1 %v4512_v17  ;;  %v5435_v13 = vpack.c.bf16 %v1908_v11, %v1907_v9  ;;  %v2372_v9 = vld [vmem:[%s5746_s5 + $0x58] sm:$0xff] }
 0x113   :  { %v5657_v11 = vpack.c.bf16 %v2372_v9, %v2371_v6 }
 0x115   :  { %4515 = vmatpush3.bf16.msra.mxu0 %v4512_v17  ;;  %4771 = vmatpush3.bf16.msra.mxu1 %v4512_v17  ;;  %v5165_v17 = vmov 0.0  }
 0x116   :  { %4517 = vmatprep.subr.bf16.mxu0 %v4516_v20  ;;  %4773 = vmatprep.subr.bf16.mxu1 %v4516_v20 }
 0x119   :  { %4519 = vmatpush3.bf16.msra.mxu0 %v4516_v20  ;;  %4775 = vmatpush3.bf16.msra.mxu1 %v4516_v20 }
 0x11a   :  { %4521 = vmatprep.subr.bf16.mxu0 %v4520_v23  ;;  %4777 = vmatprep.subr.bf16.mxu1 %v4520_v23 }
 0x11d   :  { %4523 = vmatpush3.bf16.msra.mxu0 %v4520_v23  ;;  %4779 = vmatpush3.bf16.msra.mxu1 %v4520_v23 }
 0x11e   :  { %4525 = vmatprep.subr.bf16.mxu0 %v4524_v26  ;;  %4781 = vmatprep.subr.bf16.mxu1 %v4524_v26 }
 0x121   :  { %4527 = vmatpush3.bf16.msra.mxu0 %v4524_v26  ;;  %4783 = vmatpush3.bf16.msra.mxu1 %v4524_v26 }
 0x122   :  { %4529 = vmatprep.subr.bf16.mxu0 %v4528_v29  ;;  %4785 = vmatprep.subr.bf16.mxu1 %v4528_v29 }
 0x125   :  { %4531 = vmatpush3.bf16.msra.mxu0 %v4528_v29  ;;  %4787 = vmatpush3.bf16.msra.mxu1 %v4528_v29 }
 0x126   :  { %4788 = vmatprep.subr.bf16.mxu0 %v5163_v39  ;;  %4812 = vmatprep.subr.bf16.mxu1 %v5163_v39 }
 0x128   :  { %3574 = vmatmul.mubr.f32.vlgmr.msra.gmra.mrb[0].mxu0 %v2749_v34  ;;  %3854 = vmatmul.mubr.f32.vlgmr.msra.gmra.mrb[0].mxu1 %v2766_v35  ;;  %v1900_v34 = vld [vmem:[#allocation6 + $0x188] sm:$0xff]  ;;  %v5399_v35 = vpack.c.bf16 %v1810_v32, %v1809_v31  ;;  %v1913_v31 = vld [vmem:[#allocation6 + $0x1f0] sm:$0xff]  ;;  %v1914_v32 = vld [vmem:[#allocation6 + $0x1f8] sm:$0xff] }
 0x129   :  { %4790 = vmatpush3.bf16.msra.mxu0 %v5326_v36  ;;  %4814 = vmatpush3.bf16.msra.mxu1 %v5328_v37  ;;  %v5401_v38 = vpack.c.bf16 %v1900_v34, %v1899_v33  ;;  %v5459_v34 = vpack.c.bf16 %v1914_v32, %v1913_v31 }
 0x12a   :  { %4791 = vmatprep.subr.bf16.mxu0 %v5163_v39  ;;  %4815 = vmatprep.subr.bf16.mxu1 %v5163_v39 }
 0x12b   :  { %3888 = vmatprep.mubr.msk.f32.mxu0 %vm5164_vm0, %v5165_v17  ;;  %3923 = vmatprep.mubr.msk.f32.mxu1 %vm5164_vm0, %v5165_v17 }
 0x12d   :  { %4793 = vmatpush3.bf16.msra.mxu0 %v5334_v43  ;;  %4817 = vmatpush3.bf16.msra.mxu1 %v5336_v44 }
 0x12e   :  { %4794 = vmatprep.subr.bf16.mxu0 %v5163_v39  ;;  %4818 = vmatprep.subr.bf16.mxu1 %v5163_v39 }
 0x131   :  { %4796 = vmatpush3.bf16.msra.mxu0 %v5342_v49  ;;  %4820 = vmatpush3.bf16.msra.mxu1 %v5344_v50 }
 0x132   :  { %4797 = vmatprep.subr.bf16.mxu0 %v5163_v39  ;;  %4821 = vmatprep.subr.bf16.mxu1 %v5163_v39 }
 0x135   :  { %4799 = vmatpush3.bf16.msra.mxu0 %v5350_v55  ;;  %4823 = vmatpush3.bf16.msra.mxu1 %v5352_v56 }
 0x136   :  { %4800 = vmatprep.subr.bf16.mxu0 %v5163_v39  ;;  %4824 = vmatprep.subr.bf16.mxu1 %v5163_v39 }
 0x139   :  { %4802 = vmatpush3.bf16.msra.mxu0 %v5358_v61  ;;  %4826 = vmatpush3.bf16.msra.mxu1 %v5360_v62 }
 0x13a   :  { %4803 = vmatprep.subr.bf16.mxu0 %v5163_v39  ;;  %4827 = vmatprep.subr.bf16.mxu1 %v5163_v39 }
 0x13d   :  { %4805 = vmatpush3.bf16.msra.mxu0 %v5368_v2  ;;  %4829 = vmatpush3.bf16.msra.mxu1 %v5370_v4 }
 0x13e   :  { %4806 = vmatprep.subr.bf16.mxu0 %v5163_v39  ;;  %4830 = vmatprep.subr.bf16.mxu1 %v5163_v39 }
 0x141   :  { %4808 = vmatpush3.bf16.msra.mxu0 %v5376_v8  ;;  %4832 = vmatpush3.bf16.msra.mxu1 %v5378_v10 }
 0x142   :  { %4809 = vmatprep.subr.bf16.mxu0 %v5163_v39  ;;  %4833 = vmatprep.subr.bf16.mxu1 %v5163_v39 }
 0x145   :  { %4811 = vmatpush3.bf16.msra.mxu0 %v5383_v14  ;;  %4835 = vmatpush3.bf16.msra.mxu1 %v5386_v16 }
 0x146   :  { %4836 = vmatprep.subr.bf16.mxu0 %v5163_v39  ;;  %4860 = vmatprep.subr.bf16.mxu1 %v5163_v39 }
 0x1fb   :  { %v3575_v19 = vpop.f32.mrb[0].mxu0  ;;  %v3855_v20 = vpop.f32.mrb[0].mxu1 }
 0x1fc   :  { %v840_v21 = vadd.f32 %v3575_v19, %v2750_v18  ;;  %v1625_v22 = vadd.f32 %v3855_v20, %v2750_v18  ;;  %v821_v23 = vpop.f32.mrb[1].mxu0  ;;  %v1606_v24 = vpop.f32.mrb[1].mxu1  ;;  %v1909_v19 = vld [vmem:[#allocation6 + $0x1d0] sm:$0xff]  ;;  %v1910_v20 = vld [vmem:[#allocation6 + $0x1d8] sm:$0xff] }
 0x1fd   :  { %v839_v25 = vadd.f32 %v2750_v18, %v821_v23  ;;  %v1624_v26 = vadd.f32 %v2750_v18, %v1606_v24  ;;  %v1820_v18 = vld [vmem:[#allocation6 + $0x158] sm:$0xff]  ;;  %v1821_v23 = vld [vmem:[#allocation6 + $0x160] sm:$0xff]  ;;  %v1822_v24 = vld [vmem:[#allocation6 + $0x168] sm:$0xff] }
 0x1fe   :  { %v842_v27 = vmax.f32 %v840_v21, 0.0  ;;  %v1627_v28 = vmax.f32 %v1625_v22, 0.0  ;;  %v5441_v21 = vpack.c.bf16 %v1820_v18, %v1819_v15  ;;  %v5443_v22 = vpack.c.bf16 %v1910_v20, %v1909_v19  ;;  %v2373_v15 = vld [vmem:[%s5746_s5 + $0x60] sm:$0xff]  ;;  %v2374_v19 = vld [vmem:[%s5746_s5 + $0x68] sm:$0xff]  ;;  %v2784_v20 = vld [vmem:[%s5746_s5 + $0xf0] sm:$0xff] }
 0x1ff   :  { %v841_v29 = vmax.f32 %v839_v25, 0.0  ;;  %v1626_v30 = vmax.f32 %v1624_v26, 0.0  ;;  %v1911_v25 = vld [vmem:[#allocation6 + $0x1e0] sm:$0xff]  ;;  %v1912_v26 = vld [vmem:[#allocation6 + $0x1e8] sm:$0xff] }
 0x200   :  { %844 = vst [vmem:[#allocation2 + $0x8] sm:$0x7f] %v842_v27  ;;  %1629 = vst [vmem:[#allocation2 + $0x17] sm:$0x7f] %v1627_v28  ;;  %v5449_v27 = vpack.c.bf16 %v1822_v24, %v1821_v23  ;;  %v5451_v28 = vpack.c.bf16 %v1912_v26, %v1911_v25  ;;  %v2375_v23 = vld [vmem:[%s5746_s5 + $0x70] sm:$0xff]  ;;  %v2376_v24 = vld [vmem:[%s5746_s5 + $0x78] sm:$0xff] }
 0x201   :  { %843 = vst [vmem:[#allocation2] sm:$0xff] %v841_v29  ;;  %1628 = vst [vmem:[#allocation2 + $0xf] sm:$0xff] %v1626_v30  ;;  %v1823_v29 = vld [vmem:[#allocation6 + $0x170] sm:$0xff]  ;;  %v1824_v30 = vld [vmem:[#allocation6 + $0x178] sm:$0xff]  ;;  %v5026_v26 = vpack.c.bf16 %v2376_v24, %v2375_v23 }
 0x202   :  { %v5457_v33 = vpack.c.bf16 %v1824_v30, %v1823_v29 }
 0x208   :  { %v1648_v46 = vld [vmem:[#allocation2 + $0x1] ss:$2 sm:$0x3f]  ;;  %v1630_v47 = vld [vmem:[#allocation2] ss:$2 sm:$0x3f] }
 0x209   :  { %3889 = vmatmul.mubr.f32.vlgmr.msra.gmra.mrb[2].mxu0 %v1648_v46  ;;  %3924 = vmatmul.mubr.f32.vlgmr.msra.gmra.mrb[2].mxu1 %v1630_v47  ;;  %v1807_v40 = vld [vmem:[#allocation2 + $0x2] ss:$2 sm:$0x3f]  ;;  %v1897_v41 = vld [vmem:[#allocation2 + $0x3] ss:$2 sm:$0x3f]  ;;  %v5595_v47 = vpack.c.bf16 %v2366_v45, %v2365_v42 }
 0x20a   :  { %4838 = vmatpush3.bf16.msra.mxu0 %v5399_v35  ;;  %4862 = vmatpush3.bf16.msra.mxu1 %v5401_v38 }
 0x20b   :  { %4839 = vmatprep.subr.bf16.mxu0 %v5163_v39  ;;  %4863 = vmatprep.subr.bf16.mxu1 %v5163_v39 }
 0x20c   :  { %3958 = vmatprep.mubr.msk.f32.mxu0 %vm5164_vm0, %v5165_v17  ;;  %3993 = vmatprep.mubr.msk.f32.mxu1 %vm5164_vm0, %v5165_v17 }
 0x20e   :  { %4841 = vmatpush3.bf16.msra.mxu0 %v5405_v48  ;;  %4865 = vmatpush3.bf16.msra.mxu1 %v5407_v51 }
 0x20f   :  { %4842 = vmatprep.subr.bf16.mxu0 %v5163_v39  ;;  %4866 = vmatprep.subr.bf16.mxu1 %v5163_v39 }
 0x212   :  { %4844 = vmatpush3.bf16.msra.mxu0 %v5417_v58  ;;  %4868 = vmatpush3.bf16.msra.mxu1 %v5419_v59 }
 0x213   :  { %4845 = vmatprep.subr.bf16.mxu0 %v5163_v39  ;;  %4869 = vmatprep.subr.bf16.mxu1 %v5163_v39 }
 0x216   :  { %4847 = vmatpush3.bf16.msra.mxu0 %v5425_v3  ;;  %4871 = vmatpush3.bf16.msra.mxu1 %v5427_v5 }
 0x217   :  { %4848 = vmatprep.subr.bf16.mxu0 %v5163_v39  ;;  %4872 = vmatprep.subr.bf16.mxu1 %v5163_v39 }
 0x21a   :  { %4850 = vmatpush3.bf16.msra.mxu0 %v5433_v12  ;;  %4874 = vmatpush3.bf16.msra.mxu1 %v5435_v13 }
 0x21b   :  { %4851 = vmatprep.subr.bf16.mxu0 %v5163_v39  ;;  %4875 = vmatprep.subr.bf16.mxu1 %v5163_v39 }
 0x21e   :  { %4853 = vmatpush3.bf16.msra.mxu0 %v5441_v21  ;;  %4877 = vmatpush3.bf16.msra.mxu1 %v5443_v22 }
 0x21f   :  { %4854 = vmatprep.subr.bf16.mxu0 %v5163_v39  ;;  %4878 = vmatprep.subr.bf16.mxu1 %v5163_v39 }
 0x222   :  { %4856 = vmatpush3.bf16.msra.mxu0 %v5449_v27  ;;  %4880 = vmatpush3.bf16.msra.mxu1 %v5451_v28 }
 0x223   :  { %4857 = vmatprep.subr.bf16.mxu0 %v5163_v39  ;;  %4881 = vmatprep.subr.bf16.mxu1 %v5163_v39 }
 0x226   :  { %4859 = vmatpush3.bf16.msra.mxu0 %v5457_v33  ;;  %4883 = vmatpush3.bf16.msra.mxu1 %v5459_v34 }
 0x227   :  { %4884 = vmatprep.subr.bf16.mxu0 %v5163_v39  ;;  %4908 = vmatprep.subr.bf16.mxu1 %v5163_v39 }
 0x229   :  { %3959 = vmatmul.mubr.f32.vlgmr.msra.gmra.mrb[4].mxu0 %v1807_v40  ;;  %3994 = vmatmul.mubr.f32.vlgmr.msra.gmra.mrb[4].mxu1 %v1897_v41 }
 0x22a   :  { %4886 = vmatpush3.bf16.msra.mxu0 %v5326_v36  ;;  %4910 = vmatpush3.bf16.msra.mxu1 %v5328_v37  ;;  %v2015_v36 = vld [vmem:[#allocation2 + $0x10] ss:$2 sm:$0x3f]  ;;  %v1997_v37 = vld [vmem:[#allocation2 + $0xf] ss:$2 sm:$0x3f] }
 0x22b   :  { %4887 = vmatprep.subr.bf16.mxu0 %v5163_v39  ;;  %4911 = vmatprep.subr.bf16.mxu1 %v5163_v39 }
 0x22c   :  { %4028 = vmatprep.mubr.msk.f32.mxu0 %vm5164_vm0, %v5165_v17  ;;  %4063 = vmatprep.mubr.msk.f32.mxu1 %vm5164_vm0, %v5165_v17 }
 0x22e   :  { %4889 = vmatpush3.bf16.msra.mxu0 %v5334_v43  ;;  %4913 = vmatpush3.bf16.msra.mxu1 %v5336_v44  ;;  %v2770_v43 = vld [vmem:[%s5746_s5 + $0x80] sm:$0xff]  ;;  %v2771_v44 = vld [vmem:[%s5746_s5 + $0x88] sm:$0xff] }
 0x22f   :  { %4890 = vmatprep.subr.bf16.mxu0 %v5163_v39  ;;  %4914 = vmatprep.subr.bf16.mxu1 %v5163_v39 }
 0x232   :  { %4892 = vmatpush3.bf16.msra.mxu0 %v5342_v49  ;;  %4916 = vmatpush3.bf16.msra.mxu1 %v5344_v50  ;;  %v2361_v49 = vld [vmem:[%s5746_s5] sm:$0xff]  ;;  %v2362_v50 = vld [vmem:[%s5746_s5 + $0x8] sm:$0xff] }
 0x233   :  { %4893 = vmatprep.subr.bf16.mxu0 %v5163_v39  ;;  %4917 = vmatprep.subr.bf16.mxu1 %v5163_v39 }
 0x236   :  { %4895 = vmatpush3.bf16.msra.mxu0 %v5350_v55  ;;  %4919 = vmatpush3.bf16.msra.mxu1 %v5352_v56  ;;  %v5549_v55 = vpack.c.bf16 %v2771_v44, %v2770_v43  ;;  %v5551_v56 = vpack.c.bf16 %v2362_v50, %v2361_v49 }
 0x237   :  { %4896 = vmatprep.subr.bf16.mxu0 %v5163_v39  ;;  %4920 = vmatprep.subr.bf16.mxu1 %v5163_v39 }
 0x23a   :  { %4898 = vmatpush3.bf16.msra.mxu0 %v5358_v61  ;;  %4922 = vmatpush3.bf16.msra.mxu1 %v5360_v62  ;;  %v2772_v61 = vld [vmem:[%s5746_s5 + $0x90] sm:$0xff]  ;;  %v2773_v62 = vld [vmem:[%s5746_s5 + $0x98] sm:$0xff] }
 0x23b   :  { %4899 = vmatprep.subr.bf16.mxu0 %v5163_v39  ;;  %4923 = vmatprep.subr.bf16.mxu1 %v5163_v39 }
 0x23e   :  { %4901 = vmatpush3.bf16.msra.mxu0 %v5368_v2  ;;  %4925 = vmatpush3.bf16.msra.mxu1 %v5370_v4  ;;  %v2363_v2 = vld [vmem:[%s5746_s5 + $0x10] sm:$0xff]  ;;  %v2364_v4 = vld [vmem:[%s5746_s5 + $0x18] sm:$0xff] }
 0x23f   :  { %4902 = vmatprep.subr.bf16.mxu0 %v5163_v39  ;;  %4926 = vmatprep.subr.bf16.mxu1 %v5163_v39 }
 0x242   :  { %4904 = vmatpush3.bf16.msra.mxu0 %v5376_v8  ;;  %4928 = vmatpush3.bf16.msra.mxu1 %v5378_v10  ;;  %v2173_v8 = vld [vmem:[#allocation2 + $0x11] ss:$2 sm:$0x3f]  ;;  %v2262_v10 = vld [vmem:[#allocation2 + $0x12] ss:$2 sm:$0x3f] }
 0x243   :  { %4905 = vmatprep.subr.bf16.mxu0 %v5163_v39  ;;  %4929 = vmatprep.subr.bf16.mxu1 %v5163_v39 }
 0x246   :  { %4907 = vmatpush3.bf16.msra.mxu0 %v5383_v14  ;;  %4931 = vmatpush3.bf16.msra.mxu1 %v5386_v16  ;;  %v5569_v14 = vpack.c.bf16 %v2773_v62, %v2772_v61  ;;  %v5571_v16 = vpack.c.bf16 %v2364_v4, %v2363_v2 }
 0x247   :  { %4932 = vmatprep.subr.bf16.mxu0 %v5163_v39  ;;  %4956 = vmatprep.subr.bf16.mxu1 %v5163_v39 }
 0x249   :  { %4029 = vmatmul.mubr.f32.vlgmr.msra.gmra.mrb[6].mxu0 %v2015_v36  ;;  %4064 = vmatmul.mubr.f32.vlgmr.msra.gmra.mrb[6].mxu1 %v1997_v37  ;;  %v2768_v36 = vld [vmem:[%s5745_s4] ss:$0 sm:$0xff] }
 0x24a   :  { %4934 = vmatpush3.bf16.msra.mxu0 %v5399_v35  ;;  %4958 = vmatpush3.bf16.msra.mxu1 %v5401_v38  ;;  %v2774_v35 = vld [vmem:[%s5746_s5 + $0xa0] sm:$0xff]  ;;  %v2775_v38 = vld [vmem:[%s5746_s5 + $0xa8] sm:$0xff] }
 0x24b   :  { %4935 = vmatprep.subr.bf16.mxu0 %v5163_v39  ;;  %4959 = vmatprep.subr.bf16.mxu1 %v5163_v39  ;;  %v5593_v46 = vpack.c.bf16 %v2775_v38, %v2774_v35 }
 0x24c   :  { %4098 = vmatprep.mubr.msk.f32.mxu0 %vm5164_vm0, %v5165_v17  ;;  %4133 = vmatprep.mubr.msk.f32.mxu1 %vm5164_vm0, %v5165_v17 }
 0x24e   :  { %4937 = vmatpush3.bf16.msra.mxu0 %v5405_v48  ;;  %4961 = vmatpush3.bf16.msra.mxu1 %v5407_v51  ;;  %v2776_v48 = vld [vmem:[%s5746_s5 + $0xb0] sm:$0xff]  ;;  %v2777_v51 = vld [vmem:[%s5746_s5 + $0xb8] sm:$0xff] }
 0x24f   :  { %4938 = vmatprep.subr.bf16.mxu0 %v5163_v39  ;;  %4962 = vmatprep.subr.bf16.mxu1 %v5163_v39  ;;  %v5613_v54 = vpack.c.bf16 %v2777_v51, %v2776_v48 }
 0x252   :  { %4940 = vmatpush3.bf16.msra.mxu0 %v5417_v58  ;;  %4964 = vmatpush3.bf16.msra.mxu1 %v5419_v59  ;;  %v2778_v58 = vld [vmem:[%s5746_s5 + $0xc0] sm:$0xff]  ;;  %v2779_v59 = vld [vmem:[%s5746_s5 + $0xc8] sm:$0xff] }
 0x253   :  { %4941 = vmatprep.subr.bf16.mxu0 %v5163_v39  ;;  %4965 = vmatprep.subr.bf16.mxu1 %v5163_v39  ;;  %v5632_v63 = vpack.c.bf16 %v2779_v59, %v2778_v58 }
 0x256   :  { %4943 = vmatpush3.bf16.msra.mxu0 %v5425_v3  ;;  %4967 = vmatpush3.bf16.msra.mxu1 %v5427_v5  ;;  %v2780_v3 = vld [vmem:[%s5746_s5 + $0xd0] sm:$0xff]  ;;  %v2781_v5 = vld [vmem:[%s5746_s5 + $0xd8] sm:$0xff] }
 0x257   :  { %4944 = vmatprep.subr.bf16.mxu0 %v5163_v39  ;;  %4968 = vmatprep.subr.bf16.mxu1 %v5163_v39  ;;  %v5652_v7 = vpack.c.bf16 %v2781_v5, %v2780_v3 }
 0x25a   :  { %4946 = vmatpush3.bf16.msra.mxu0 %v5433_v12  ;;  %4970 = vmatpush3.bf16.msra.mxu1 %v5435_v13  ;;  %v2782_v12 = vld [vmem:[%s5746_s5 + $0xe0] sm:$0xff]  ;;  %v2783_v13 = vld [vmem:[%s5746_s5 + $0xe8] sm:$0xff] }
 0x25b   :  { %4947 = vmatprep.subr.bf16.mxu0 %v5163_v39  ;;  %4971 = vmatprep.subr.bf16.mxu1 %v5163_v39  ;;  %v5672_v18 = vpack.c.bf16 %v2783_v13, %v2782_v12 }
 0x25e   :  { %4949 = vmatpush3.bf16.msra.mxu0 %v5441_v21  ;;  %4973 = vmatpush3.bf16.msra.mxu1 %v5443_v22  ;;  %v2785_v21 = vld [vmem:[%s5746_s5 + $0xf8] sm:$0xff]  ;;  %v5683_v22 = vpack.c.bf16 %v2374_v19, %v2373_v15 }
 0x25f   :  { %4950 = vmatprep.subr.bf16.mxu0 %v5163_v39  ;;  %4974 = vmatprep.subr.bf16.mxu1 %v5163_v39  ;;  %v5002_v25 = vpack.c.bf16 %v2785_v21, %v2784_v20 }
 0x262   :  { %4952 = vmatpush3.bf16.msra.mxu0 %v5449_v27  ;;  %4976 = vmatpush3.bf16.msra.mxu1 %v5451_v28 }
 0x263   :  { %4953 = vmatprep.subr.bf16.mxu0 %v5163_v39  ;;  %4977 = vmatprep.subr.bf16.mxu1 %v5163_v39 }
 0x266   :  { %4955 = vmatpush3.bf16.msra.mxu0 %v5457_v33  ;;  %4979 = vmatpush3.bf16.msra.mxu1 %v5459_v34 }
 0x267   :  { %4980 = vmatprep.subr.bf16.mxu0 %v5163_v39  ;;  %5004 = vmatprep.subr.bf16.mxu1 %v5163_v39 }
 0x269   :  { %4099 = vmatmul.mubr.f32.vlgmr.msra.gmra.mrb[8].mxu0 %v2173_v8  ;;  %4134 = vmatmul.mubr.f32.vlgmr.msra.gmra.mrb[8].mxu1 %v2262_v10 }
 0x26a   :  { %4982 = vmatpush3.bf16.msra.mxu0 %v5549_v55  ;;  %5006 = vmatpush3.bf16.msra.mxu1 %v5551_v56 }
 0x26b   :  { %4983 = vmatprep.subr.bf16.mxu0 %v5163_v39  ;;  %5007 = vmatprep.subr.bf16.mxu1 %v5163_v39 }
 0x26c   :  { %4168 = vmatprep.mubr.msk.f32.mxu0 %vm5164_vm0, %v5165_v17  ;;  %4203 = vmatprep.mubr.msk.f32.mxu1 %vm5164_vm0, %v5165_v17 }
 0x26e   :  { %4985 = vmatpush3.bf16.msra.mxu0 %v5569_v14  ;;  %5009 = vmatpush3.bf16.msra.mxu1 %v5571_v16 }
 0x26f   :  { %4986 = vmatprep.subr.bf16.mxu0 %v5163_v39  ;;  %5010 = vmatprep.subr.bf16.mxu1 %v5163_v39 }
 0x272   :  { %4988 = vmatpush3.bf16.msra.mxu0 %v5593_v46  ;;  %5012 = vmatpush3.bf16.msra.mxu1 %v5595_v47 }
 0x273   :  { %4989 = vmatprep.subr.bf16.mxu0 %v5163_v39  ;;  %5013 = vmatprep.subr.bf16.mxu1 %v5163_v39 }
 0x276   :  { %4991 = vmatpush3.bf16.msra.mxu0 %v5613_v54  ;;  %5015 = vmatpush3.bf16.msra.mxu1 %v5615_v57 }
 0x277   :  { %4992 = vmatprep.subr.bf16.mxu0 %v5163_v39  ;;  %5016 = vmatprep.subr.bf16.mxu1 %v5163_v39 }
 0x27a   :  { %4994 = vmatpush3.bf16.msra.mxu0 %v5632_v63  ;;  %5018 = vmatpush3.bf16.msra.mxu1 %v5637_v1 }
 0x27b   :  { %4995 = vmatprep.subr.bf16.mxu0 %v5163_v39  ;;  %5019 = vmatprep.subr.bf16.mxu1 %v5163_v39 }
 0x27e   :  { %4997 = vmatpush3.bf16.msra.mxu0 %v5652_v7  ;;  %5021 = vmatpush3.bf16.msra.mxu1 %v5657_v11 }
 0x27f   :  { %4998 = vmatprep.subr.bf16.mxu0 %v5163_v39  ;;  %5022 = vmatprep.subr.bf16.mxu1 %v5163_v39 }
 0x282   :  { %5000 = vmatpush3.bf16.msra.mxu0 %v5672_v18  ;;  %5024 = vmatpush3.bf16.msra.mxu1 %v5683_v22 }
 0x283   :  { %5001 = vmatprep.subr.bf16.mxu0 %v5163_v39  ;;  %5025 = vmatprep.subr.bf16.mxu1 %v5163_v39 }
 0x286   :  { %5003 = vmatpush3.bf16.msra.mxu0 %v5002_v25  ;;  %5027 = vmatpush3.bf16.msra.mxu1 %v5026_v26 }
 0x287   :  { %5028 = vmatprep.subr.bf16.mxu0 %v5163_v39  ;;  %5052 = vmatprep.subr.bf16.mxu1 %v5163_v39 }
 0x2dc   :  { %v1732_v27 = vpop.f32.mrb[2].mxu0  ;;  %v1802_v28 = vpop.f32.mrb[2].mxu1 }
 0x2dd   :  { %v1803_v29 = vadd.f32 %v1802_v28, %v1732_v27  ;;  %v3890_v30 = vpop.f32.mrb[3].mxu0  ;;  %v3925_v31 = vpop.f32.mrb[3].mxu1 }
 0x2fc   :  { %v1891_v32 = vpop.f32.mrb[4].mxu0  ;;  %v1981_v33 = vpop.f32.mrb[4].mxu1 }
 0x2fd   :  { %v1895_v34 = vadd.f32 %v1891_v32, %v1803_v29  ;;  %v3960_v40 = vpop.f32.mrb[5].mxu0  ;;  %v3995_v41 = vpop.f32.mrb[5].mxu1 }
 0x2ff   :  { %v1985_v37 = vadd.f32 %v1981_v33, %v1895_v34 }
 0x301   :  { %v1993_v43 = vadd.f32 %v2768_v36, %v1985_v37 }
 0x303   :  { %v1994_v44 = vmax.f32 %v1993_v43, 0.0 }
 0x305   :  { %1995 = vst [vmem:[#allocation3] sm:$0x3f] %v1994_v44 }
 0x30c   :  { %v2377_v49 = vld [vmem:[#allocation3 + $0x1] sm:$0x1f] }
 0x30d   :  { %v2360_v50 = vld [vmem:[#allocation3] sm:$0x1f]  ;;  %4169 = vmatmul.mubr.f32.vlgmr.msra.gmra.mrb[10].mxu0 %v2377_v49 }
 0x30e   :  { %4204 = vmatmul.mubr.f32.vlgmr.msra.gmra.mrb[10].mxu1 %v2360_v50  ;;  %5030 = vmatpush3.bf16.msra.mxu0 %v5549_v55 }
 0x30f   :  { %5054 = vmatpush3.bf16.msra.mxu1 %v5551_v56  ;;  %5031 = vmatprep.subr.bf16.mxu0 %v5163_v39 }
 0x310   :  { %5055 = vmatprep.subr.bf16.mxu1 %v5163_v39  ;;  %4238 = vmatprep.mubr.msk.f32.mxu0 %vm5164_vm0, %v5165_v17 }
 0x311   :  { %4273 = vmatprep.mubr.msk.f32.mxu1 %vm5164_vm0, %v5165_v17 }
 0x312   :  { %5033 = vmatpush3.bf16.msra.mxu0 %v5569_v14 }
 0x313   :  { %5057 = vmatpush3.bf16.msra.mxu1 %v5571_v16  ;;  %5034 = vmatprep.subr.bf16.mxu0 %v5163_v39 }
 0x314   :  { %5058 = vmatprep.subr.bf16.mxu1 %v5163_v39 }
 0x316   :  { %5036 = vmatpush3.bf16.msra.mxu0 %v5593_v46 }
 0x317   :  { %5060 = vmatpush3.bf16.msra.mxu1 %v5595_v47  ;;  %5037 = vmatprep.subr.bf16.mxu0 %v5163_v39 }
 0x318   :  { %5061 = vmatprep.subr.bf16.mxu1 %v5163_v39 }
 0x31a   :  { %5039 = vmatpush3.bf16.msra.mxu0 %v5613_v54 }
 0x31b   :  { %5063 = vmatpush3.bf16.msra.mxu1 %v5615_v57  ;;  %5040 = vmatprep.subr.bf16.mxu0 %v5163_v39 }
 0x31c   :  { %5064 = vmatprep.subr.bf16.mxu1 %v5163_v39  ;;  %v2098_v17 = vpop.f32.mrb[6].mxu0  ;;  %v2168_v55 = vpop.f32.mrb[6].mxu1 }
 0x31d   :  { %v2169_v56 = vadd.f32 %v2168_v55, %v2098_v17  ;;  %v4030_v61 = vpop.f32.mrb[7].mxu0  ;;  %v4065_v62 = vpop.f32.mrb[7].mxu1 }
 0x31e   :  { %5042 = vmatpush3.bf16.msra.mxu0 %v5632_v63 }
 0x31f   :  { %5066 = vmatpush3.bf16.msra.mxu1 %v5637_v1  ;;  %5043 = vmatprep.subr.bf16.mxu0 %v5163_v39 }
 0x320   :  { %5067 = vmatprep.subr.bf16.mxu1 %v5163_v39 }
 0x322   :  { %5045 = vmatpush3.bf16.msra.mxu0 %v5652_v7 }
 0x323   :  { %5069 = vmatpush3.bf16.msra.mxu1 %v5657_v11  ;;  %5046 = vmatprep.subr.bf16.mxu0 %v5163_v39 }
 0x324   :  { %5070 = vmatprep.subr.bf16.mxu1 %v5163_v39 }
 0x326   :  { %5048 = vmatpush3.bf16.msra.mxu0 %v5672_v18 }
 0x327   :  { %5072 = vmatpush3.bf16.msra.mxu1 %v5683_v22  ;;  %5049 = vmatprep.subr.bf16.mxu0 %v5163_v39 }
 0x328   :  { %5073 = vmatprep.subr.bf16.mxu1 %v5163_v39  ;;  %v2786_v39 = vld [vmem:[%s5747_s6] ss:$0 sm:$0xff] }
 0x32a   :  { %5051 = vmatpush3.bf16.msra.mxu0 %v5002_v25 }
 0x32b   :  { %5075 = vmatpush3.bf16.msra.mxu1 %v5026_v26 }
 0x33c   :  { %v2256_v2 = vpop.f32.mrb[8].mxu0  ;;  %v2345_v4 = vpop.f32.mrb[8].mxu1 }
 0x33d   :  { %v2260_v8 = vadd.f32 %v2256_v2, %v2169_v56  ;;  %v4100_v10 = vpop.f32.mrb[9].mxu0  ;;  %v4135_v14 = vpop.f32.mrb[9].mxu1 }
 0x33f   :  { %v2349_v16 = vadd.f32 %v2345_v4, %v2260_v8 }
 0x341   :  { %v2357_v35 = vadd.f32 %v2768_v36, %v2349_v16 }
 0x343   :  { %v2358_v38 = vmax.f32 %v2357_v35, 0.0 }
 0x345   :  { %2359 = vst [vmem:[#allocation3 + $0x6] sm:$0x3f] %v2358_v38 }
 0x34c   :  { %v2562_v42 = vld [vmem:[#allocation3 + $0x7] sm:$0x1f] }
 0x34d   :  { %v2545_v45 = vld [vmem:[#allocation3 + $0x6] sm:$0x1f]  ;;  %4239 = vmatmul.mubr.f32.vlgmr.msra.gmra.mrb[12].mxu0 %v2562_v42 }
 0x34e   :  { %4274 = vmatmul.mubr.f32.vlgmr.msra.gmra.mrb[12].mxu1 %v2545_v45 }
 0x3e0   :  { %v2461_v46 = vpop.f32.mrb[10].mxu0 }
 0x3e1   :  { %v2531_v47 = vpop.f32.mrb[10].mxu1  ;;  %v4170_v51 = vpop.f32.mrb[11].mxu0 }
 0x3e2   :  { %v2532_v48 = vadd.f32 %v2531_v47, %v2461_v46  ;;  %v4205_v52 = vpop.f32.mrb[11].mxu1 }
 0x3e4   :  { %v2542_v53 = vadd.f32 %v2786_v39, %v2532_v48 }
 0x3e6   :  { %v2543_v54 = vmax.f32 %v2542_v53, 0.0 }
 0x3e8   :  { %2544 = vst [vmem:[%s5748_s7] sm:$0x1f] %v2543_v54 }
 0x420   :  { %v2645_v57 = vpop.f32.mrb[12].mxu0 }
 0x421   :  { %v2715_v58 = vpop.f32.mrb[12].mxu1  ;;  %v4240_v60 = vpop.f32.mrb[13].mxu0 }
 0x422   :  { %v2716_v59 = vadd.f32 %v2715_v58, %v2645_v57  ;;  %v4275_v63 = vpop.f32.mrb[13].mxu1 }
 0x424   :  { %v2726_v0 = vadd.f32 %v2786_v39, %v2716_v59 }
 0x426   :  { %v2727_v1 = vmax.f32 %v2726_v0, 0.0 }
 0x428   :  { %2728 = vst [vmem:[%s5748_s7 + $0x5] sm:$0x1f] %v2727_v1 }
 0x429   :  { %2733 = vsyncpa [#allocation5], 1 }
 0x42a   :  { %2734 = vsyncpa [#allocation7], 1 }

</bundles_post_ra>
